<compile_context>
chip_gen: v5e
topology: v5e:2x2
jax: 0.10.0
libtpu: 0.0.40
codegen_flags: <defaults>
</compile_context>

<pallas_src>
import functools

import jax
import jax.numpy as jnp
from jax.experimental import pallas as pl
from jax.experimental.pallas import tpu as pltpu

_INV_SQRT2 = 0.7071067811865476
_LANE = 128
_SUBLANE = 8


def _round_up(x, m):
    return ((x + m - 1) // m) * m


def _gelu(x, approximate):
    if approximate:
        # tanh formulation -> EUP (otherwise-idle bundle slot) instead of the long erf
        # VALU polynomial. Opt-in; not bit-parity with torch nn.GELU().
        return jax.nn.gelu(x, approximate=True)
    # PyTorch nn.GELU() default = exact erf formulation (computed in f32).
    return 0.5 * x * (1.0 + jax.lax.erf(x * _INV_SQRT2))


def _encoder_kernel(x_ref,
                    w0_ref, b0_ref, w1_ref, b1_ref, w2_ref, b2_ref,
                    w3_ref, b3_ref, w4_ref, b4_ref, w5_ref, b5_ref,
                    out_ref, *, gelu_approximate):
    # MXU operand dtype follows the (pre-cast) weights: bf16 fast path by default.
    cdt = w0_ref.dtype

    # Hoist bias loads once (f32).
    b0 = b0_ref[...]
    b1 = b1_ref[...]
    b2 = b2_ref[...]
    b3 = b3_ref[...]
    b4 = b4_ref[...]
    b5 = b5_ref[...]

    h = x_ref[...].astype(cdt)
    z = jnp.dot(h, w0_ref[...], preferred_element_type=jnp.float32) + b0
    h = _gelu(z, gelu_approximate).astype(cdt)
    z = jnp.dot(h, w1_ref[...], preferred_element_type=jnp.float32) + b1
    h = _gelu(z, gelu_approximate).astype(cdt)
    z = jnp.dot(h, w2_ref[...], preferred_element_type=jnp.float32) + b2
    h = _gelu(z, gelu_approximate).astype(cdt)
    z = jnp.dot(h, w3_ref[...], preferred_element_type=jnp.float32) + b3
    h = _gelu(z, gelu_approximate).astype(cdt)
    z = jnp.dot(h, w4_ref[...], preferred_element_type=jnp.float32) + b4
    h = _gelu(z, gelu_approximate).astype(cdt)
    z = jnp.dot(h, w5_ref[...], preferred_element_type=jnp.float32) + b5
    out_ref[...] = z.astype(out_ref.dtype)


def prepare_encoder_params(params, *, compute_dtype=jnp.bfloat16):
    """One-time pad + cast of the 6 (W[in,out], b[1,out]) pairs (weights stored transposed
    vs torch). Do this once and reuse across calls so no per-call cast/copy is scheduled."""
    params = [(jnp.asarray(w), jnp.asarray(b).reshape(1, -1)) for (w, b) in params]
    in_dim = params[0][0].shape[0]
    out_dim = params[-1][0].shape[1]
    in_dim_p = max(_LANE, _round_up(in_dim, _LANE))
    out_dim_p = max(_LANE, _round_up(out_dim, _LANE))

    # Pad W0 rows so the (zero-padded) 128-lane input contributes nothing.
    w0, b0 = params[0]
    if in_dim_p != in_dim:
        w0 = jnp.pad(w0, ((0, in_dim_p - in_dim), (0, 0)))
    params[0] = (w0, b0)

    # Pad last layer cols / bias for lane-dense (unmasked) output stores.
    w5, b5 = params[-1]
    if out_dim_p != out_dim:
        w5 = jnp.pad(w5, ((0, 0), (0, out_dim_p - out_dim)))
        b5 = jnp.pad(b5, ((0, 0), (0, out_dim_p - out_dim)))
    params[-1] = (w5, b5)

    flat, dims = [], []
    for (w, b) in params:
        flat.append(w.astype(compute_dtype))      # MXU operands
        flat.append(b.astype(jnp.float32))        # biases stay f32
        dims.append(w.shape)

    return {
        "flat": tuple(flat),
        "dims": tuple(dims),
        "in_dim": in_dim,
        "in_dim_p": in_dim_p,
        "out_dim": out_dim,
        "out_dim_p": out_dim_p,
        "compute_dtype": compute_dtype,
    }


def _num_tensorcores():
    # v7x (and v4/v5p) expose 2 TensorCores per chip; v5e / v6e have 1.
    try:
        kind = (jax.devices()[0].device_kind or "").lower()
    except Exception:
        return 1
    return 2 if any(m in kind for m in ("v7", "v5p", "v4")) else 1


def _choose_tiling(batch, batch_tile, num_tc):
    b8 = _round_up(max(batch, 1), _SUBLANE)
    steps = pl.cdiv(b8, batch_tile)
    if num_tc >= 2:
        # Keep both TensorCores busy: >= 2 grid steps and an even step count.
        steps = max(steps, 2)
        steps += steps % 2
    tile = _round_up(pl.cdiv(b8, steps), _SUBLANE)
    return tile, tile * steps, steps


def encoder_forward(x, prepared, *, batch_tile=1024, gelu_approximate=False,
                    out_dtype=jnp.float32):
    """x: [B, input_dim + class_dim] float32. `prepared` from prepare_encoder_params."""
    B, in_dim = x.shape
    assert in_dim == prepared["in_dim"], "feature dim mismatch"
    in_dim_p = prepared["in_dim_p"]
    out_dim = prepared["out_dim"]
    out_dim_p = prepared["out_dim_p"]
    flat = prepared["flat"]

    num_tc = _num_tensorcores()
    tile, b_pad, steps = _choose_tiling(B, batch_tile, num_tc)

    if (b_pad, in_dim_p) != (B, in_dim):
        x = jnp.pad(x, ((0, b_pad - B), (0, in_dim_p - in_dim)))

    in_specs = [pl.BlockSpec((tile, in_dim_p), lambda i: (i, 0))]
    for a in flat:
        in_specs.append(pl.BlockSpec(a.shape, lambda i: (0, 0)))  # resident in VMEM
    out_specs = pl.BlockSpec((tile, out_dim_p), lambda i: (i, 0))

    # ---- explicit VMEM budget (v7x has only 64 MiB physical) ----
    x_bytes = 2 * tile * in_dim_p * x.dtype.itemsize                    # double-buffered in
    o_bytes = 2 * tile * out_dim_p * jnp.dtype(out_dtype).itemsize      # double-buffered out
    w_bytes = 2 * sum(int(a.size) * a.dtype.itemsize for a in flat)
    act_bytes = 4 * tile * 512 * 4                                      # f32 temporaries
    vmem_limit = int(min(48 * 2**20,
                         max(32 * 2**20, (x_bytes + o_bytes + w_bytes + act_bytes) * 3 // 2)))

    # ---- advisory cost estimate for XLA scheduling ----
    dims = prepared["dims"]
    flops = 2 * b_pad * sum(di * do for (di, do) in dims)
    transcendentals = b_pad * sum(do for (_, do) in dims[:-1])  # one erf/tanh per GELU elem
    bytes_accessed = (b_pad * (in_dim_p * x.dtype.itemsize
                               + out_dim_p * jnp.dtype(out_dtype).itemsize)
                      + sum(int(a.size) * a.dtype.itemsize for a in flat))

    kernel = functools.partial(_encoder_kernel, gelu_approximate=gelu_approximate)

    out_padded = pl.pallas_call(
        kernel,
        out_shape=jax.ShapeDtypeStruct((b_pad, out_dim_p), out_dtype),
        grid_spec=pltpu.PrefetchScalarGridSpec(
            num_scalar_prefetch=0,
            grid=(steps,),
            in_specs=in_specs,
            out_specs=out_specs,
        ),
        compiler_params=pltpu.CompilerParams(
            dimension_semantics=("parallel",),
            vmem_limit_bytes=vmem_limit),
        cost_estimate=pl.CostEstimate(
            flops=flops,
            transcendentals=transcendentals,
            bytes_accessed=bytes_accessed),
    )(x, *flat)

    return out_padded[:B, :out_dim]


def init_encoder_params(key, latent_dim, input_dim, class_dim):
    """Deterministic synthetic params matching nn.Linear shapes (stored transposed)."""
    layer_dims = [
        (input_dim + class_dim, 512),
        (512, 256),
        (256, 128),
        (128, 64),
        (64, 32),
        (32, latent_dim),
    ]
    params = []
    for (d_in, d_out) in layer_dims:
        key, kw, kb = jax.random.split(key, 3)
        scale = 1.0 / jnp.sqrt(jnp.float32(d_in))
        w = jax.random.uniform(kw, (d_in, d_out), jnp.float32, -scale, scale)
        b = jax.random.uniform(kb, (1, d_out), jnp.float32, -scale, scale)
        params.append((w, b))
    return params


def encoder_reference(x, params):
    h = x
    for idx, (w, b) in enumerate(params):
        h = h @ w + b
        if idx < len(params) - 1:
            h = _gelu(h, approximate=False)
    return h


if __name__ == "__main__":
    latent_dim, input_dim, class_dim = 16, 48, 4

    key = jax.random.PRNGKey(0)
    key, kparam = jax.random.split(key)
    params = init_encoder_params(kparam, latent_dim, input_dim, class_dim)

    # One-time prepare (pad + cast); reused across calls.
    prep_f32 = prepare_encoder_params(params, compute_dtype=jnp.float32)
    prep_bf16 = prepare_encoder_params(params)  # default bf16 MXU fast path

    for batch in (16, 13):  # sublane-aligned and ragged batch sizes
        key, kx = jax.random.split(key)
        x = jax.random.normal(kx, (batch, input_dim + class_dim), jnp.float32)
        ref = encoder_reference(x, params)

        # f32 MXU-operand path (exact-erf GELU): tight parity with the f32 reference.
        out_f32 = jax.block_until_ready(encoder_forward(x, prep_f32))
        assert out_f32.shape == (batch, latent_dim)
        assert jnp.allclose(out_f32, ref, atol=1e-4, rtol=1e-4), "f32 path mismatch"

        # Default bf16 MXU operands / f32 accumulate: looser tolerance.
        out_bf16 = jax.block_until_ready(encoder_forward(x, prep_bf16))
        assert out_bf16.shape == (batch, latent_dim)
        assert jnp.allclose(out_bf16, ref, atol=5e-2, rtol=5e-2), "bf16 path mismatch"

        # Optional approximate (tanh / EUP) GELU path.
        out_approx = jax.block_until_ready(
            encoder_forward(x, prep_bf16, gelu_approximate=True))
        assert out_approx.shape == (batch, latent_dim)
        assert jnp.allclose(out_approx, ref, atol=1e-1, rtol=1e-1), "approx-GELU mismatch"

    print("KERNEL_OK")
</pallas_src>

<mosaic_0001>
module attributes {stable_mosaic.version = 11 : i64} {
  func.func @_encoder_kernel(%arg0: i32, %arg1: memref<16x128xf32, #tpu.memory_space<vmem>>, %arg2: memref<128x512xf32, #tpu.memory_space<vmem>>, %arg3: memref<1x512xf32, #tpu.memory_space<vmem>>, %arg4: memref<512x256xf32, #tpu.memory_space<vmem>>, %arg5: memref<1x256xf32, #tpu.memory_space<vmem>>, %arg6: memref<256x128xf32, #tpu.memory_space<vmem>>, %arg7: memref<1x128xf32, #tpu.memory_space<vmem>>, %arg8: memref<128x64xf32, #tpu.memory_space<vmem>>, %arg9: memref<1x64xf32, #tpu.memory_space<vmem>>, %arg10: memref<64x32xf32, #tpu.memory_space<vmem>>, %arg11: memref<1x32xf32, #tpu.memory_space<vmem>>, %arg12: memref<32x128xf32, #tpu.memory_space<vmem>>, %arg13: memref<1x128xf32, #tpu.memory_space<vmem>>, %arg14: memref<16x128xf32, #tpu.memory_space<vmem>>) attributes {dimension_semantics = [#tpu.dimension_semantics<parallel>], iteration_bounds = array<i64: 1>, scalar_prefetch = 0 : i64, scratch_operands = 0 : i64, tpu.core_type = #tpu.core_type<tc>, window_params = [{transform_indices = @transform_0, window_bounds = array<i64: 16, 128>}, {pipeline_mode = #tpu.pipeline_mode<synchronous>, transform_indices = @transform_1, window_bounds = array<i64: 128, 512>}, {pipeline_mode = #tpu.pipeline_mode<synchronous>, transform_indices = @transform_2, window_bounds = array<i64: 1, 512>}, {pipeline_mode = #tpu.pipeline_mode<synchronous>, transform_indices = @transform_3, window_bounds = array<i64: 512, 256>}, {pipeline_mode = #tpu.pipeline_mode<synchronous>, transform_indices = @transform_4, window_bounds = array<i64: 1, 256>}, {pipeline_mode = #tpu.pipeline_mode<synchronous>, transform_indices = @transform_5, window_bounds = array<i64: 256, 128>}, {pipeline_mode = #tpu.pipeline_mode<synchronous>, transform_indices = @transform_6, window_bounds = array<i64: 1, 128>}, {pipeline_mode = #tpu.pipeline_mode<synchronous>, transform_indices = @transform_7, window_bounds = array<i64: 128, 64>}, {pipeline_mode = #tpu.pipeline_mode<synchronous>, transform_indices = @transform_8, window_bounds = array<i64: 1, 64>}, {pipeline_mode = #tpu.pipeline_mode<synchronous>, transform_indices = @transform_9, window_bounds = array<i64: 64, 32>}, {pipeline_mode = #tpu.pipeline_mode<synchronous>, transform_indices = @transform_10, window_bounds = array<i64: 1, 32>}, {pipeline_mode = #tpu.pipeline_mode<synchronous>, transform_indices = @transform_11, window_bounds = array<i64: 32, 128>}, {pipeline_mode = #tpu.pipeline_mode<synchronous>, transform_indices = @transform_12, window_bounds = array<i64: 1, 128>}, {transform_indices = @transform_13, window_bounds = array<i64: 16, 128>}]} {
    %c0 = arith.constant 0 : index
    %c0_0 = arith.constant 0 : index
    %0 = vector.load %arg3[%c0, %c0_0] : memref<1x512xf32, #tpu.memory_space<vmem>>, vector<1x512xf32>
    %c0_1 = arith.constant 0 : index
    %c0_2 = arith.constant 0 : index
    %1 = vector.load %arg5[%c0_1, %c0_2] : memref<1x256xf32, #tpu.memory_space<vmem>>, vector<1x256xf32>
    %c0_3 = arith.constant 0 : index
    %c0_4 = arith.constant 0 : index
    %2 = vector.load %arg7[%c0_3, %c0_4] : memref<1x128xf32, #tpu.memory_space<vmem>>, vector<1x128xf32>
    %c0_5 = arith.constant 0 : index
    %c0_6 = arith.constant 0 : index
    %3 = vector.load %arg9[%c0_5, %c0_6] : memref<1x64xf32, #tpu.memory_space<vmem>>, vector<1x64xf32>
    %c0_7 = arith.constant 0 : index
    %c0_8 = arith.constant 0 : index
    %4 = vector.load %arg11[%c0_7, %c0_8] : memref<1x32xf32, #tpu.memory_space<vmem>>, vector<1x32xf32>
    %c0_9 = arith.constant 0 : index
    %c0_10 = arith.constant 0 : index
    %5 = vector.load %arg13[%c0_9, %c0_10] : memref<1x128xf32, #tpu.memory_space<vmem>>, vector<1x128xf32>
    %c0_11 = arith.constant 0 : index
    %c0_12 = arith.constant 0 : index
    %6 = vector.load %arg1[%c0_11, %c0_12] : memref<16x128xf32, #tpu.memory_space<vmem>>, vector<16x128xf32>
    %c0_13 = arith.constant 0 : index
    %c0_14 = arith.constant 0 : index
    %7 = vector.load %arg2[%c0_13, %c0_14] : memref<128x512xf32, #tpu.memory_space<vmem>>, vector<128x512xf32>
    %cst = arith.constant dense<0.000000e+00> : vector<16x512xf32>
    %8 = tpu.matmul %6, %7, %cst {dimension_numbers = #tpu.dot_dimension_numbers<[1], [0], [0], [1], [0, 0, 1, 1], [], []>} : vector<16x128xf32>, vector<128x512xf32>, vector<16x512xf32> -> vector<16x512xf32>
    %9 = vector.broadcast %0 : vector<1x512xf32> to vector<16x512xf32>
    %10 = arith.addf %8, %9 : vector<16x512xf32>
    %cst_15 = arith.constant 5.000000e-01 : f32
    %11 = vector.broadcast %cst_15 : f32 to vector<16x512xf32>
    %12 = arith.mulf %11, %10 : vector<16x512xf32>
    %cst_16 = arith.constant 0.707106769 : f32
    %13 = vector.broadcast %cst_16 : f32 to vector<16x512xf32>
    %14 = arith.mulf %10, %13 : vector<16x512xf32>
    %15 = math.erf %14 : vector<16x512xf32>
    %cst_17 = arith.constant 1.000000e+00 : f32
    %16 = vector.broadcast %cst_17 : f32 to vector<16x512xf32>
    %17 = arith.addf %16, %15 : vector<16x512xf32>
    %18 = arith.mulf %12, %17 : vector<16x512xf32>
    %c0_18 = arith.constant 0 : index
    %c0_19 = arith.constant 0 : index
    %19 = vector.load %arg4[%c0_18, %c0_19] : memref<512x256xf32, #tpu.memory_space<vmem>>, vector<512x256xf32>
    %cst_20 = arith.constant dense<0.000000e+00> : vector<16x256xf32>
    %20 = tpu.matmul %18, %19, %cst_20 {dimension_numbers = #tpu.dot_dimension_numbers<[1], [0], [0], [1], [0, 0, 1, 1], [], []>} : vector<16x512xf32>, vector<512x256xf32>, vector<16x256xf32> -> vector<16x256xf32>
    %21 = vector.broadcast %1 : vector<1x256xf32> to vector<16x256xf32>
    %22 = arith.addf %20, %21 : vector<16x256xf32>
    %cst_21 = arith.constant 5.000000e-01 : f32
    %23 = vector.broadcast %cst_21 : f32 to vector<16x256xf32>
    %24 = arith.mulf %23, %22 : vector<16x256xf32>
    %cst_22 = arith.constant 0.707106769 : f32
    %25 = vector.broadcast %cst_22 : f32 to vector<16x256xf32>
    %26 = arith.mulf %22, %25 : vector<16x256xf32>
    %27 = math.erf %26 : vector<16x256xf32>
    %cst_23 = arith.constant 1.000000e+00 : f32
    %28 = vector.broadcast %cst_23 : f32 to vector<16x256xf32>
    %29 = arith.addf %28, %27 : vector<16x256xf32>
    %30 = arith.mulf %24, %29 : vector<16x256xf32>
    %c0_24 = arith.constant 0 : index
    %c0_25 = arith.constant 0 : index
    %31 = vector.load %arg6[%c0_24, %c0_25] : memref<256x128xf32, #tpu.memory_space<vmem>>, vector<256x128xf32>
    %cst_26 = arith.constant dense<0.000000e+00> : vector<16x128xf32>
    %32 = tpu.matmul %30, %31, %cst_26 {dimension_numbers = #tpu.dot_dimension_numbers<[1], [0], [0], [1], [0, 0, 1, 1], [], []>} : vector<16x256xf32>, vector<256x128xf32>, vector<16x128xf32> -> vector<16x128xf32>
    %33 = vector.broadcast %2 : vector<1x128xf32> to vector<16x128xf32>
    %34 = arith.addf %32, %33 : vector<16x128xf32>
    %cst_27 = arith.constant 5.000000e-01 : f32
    %35 = vector.broadcast %cst_27 : f32 to vector<16x128xf32>
    %36 = arith.mulf %35, %34 : vector<16x128xf32>
    %cst_28 = arith.constant 0.707106769 : f32
    %37 = vector.broadcast %cst_28 : f32 to vector<16x128xf32>
    %38 = arith.mulf %34, %37 : vector<16x128xf32>
    %39 = math.erf %38 : vector<16x128xf32>
    %cst_29 = arith.constant 1.000000e+00 : f32
    %40 = vector.broadcast %cst_29 : f32 to vector<16x128xf32>
    %41 = arith.addf %40, %39 : vector<16x128xf32>
    %42 = arith.mulf %36, %41 : vector<16x128xf32>
    %c0_30 = arith.constant 0 : index
    %c0_31 = arith.constant 0 : index
    %43 = vector.load %arg8[%c0_30, %c0_31] : memref<128x64xf32, #tpu.memory_space<vmem>>, vector<128x64xf32>
    %cst_32 = arith.constant dense<0.000000e+00> : vector<16x64xf32>
    %44 = tpu.matmul %42, %43, %cst_32 {dimension_numbers = #tpu.dot_dimension_numbers<[1], [0], [0], [1], [0, 0, 1, 1], [], []>} : vector<16x128xf32>, vector<128x64xf32>, vector<16x64xf32> -> vector<16x64xf32>
    %45 = vector.broadcast %3 : vector<1x64xf32> to vector<16x64xf32>
    %46 = arith.addf %44, %45 : vector<16x64xf32>
    %cst_33 = arith.constant 5.000000e-01 : f32
    %47 = vector.broadcast %cst_33 : f32 to vector<16x64xf32>
    %48 = arith.mulf %47, %46 : vector<16x64xf32>
    %cst_34 = arith.constant 0.707106769 : f32
    %49 = vector.broadcast %cst_34 : f32 to vector<16x64xf32>
    %50 = arith.mulf %46, %49 : vector<16x64xf32>
    %51 = math.erf %50 : vector<16x64xf32>
    %cst_35 = arith.constant 1.000000e+00 : f32
    %52 = vector.broadcast %cst_35 : f32 to vector<16x64xf32>
    %53 = arith.addf %52, %51 : vector<16x64xf32>
    %54 = arith.mulf %48, %53 : vector<16x64xf32>
    %c0_36 = arith.constant 0 : index
    %c0_37 = arith.constant 0 : index
    %55 = vector.load %arg10[%c0_36, %c0_37] : memref<64x32xf32, #tpu.memory_space<vmem>>, vector<64x32xf32>
    %cst_38 = arith.constant dense<0.000000e+00> : vector<16x32xf32>
    %56 = tpu.matmul %54, %55, %cst_38 {dimension_numbers = #tpu.dot_dimension_numbers<[1], [0], [0], [1], [0, 0, 1, 1], [], []>} : vector<16x64xf32>, vector<64x32xf32>, vector<16x32xf32> -> vector<16x32xf32>
    %57 = vector.broadcast %4 : vector<1x32xf32> to vector<16x32xf32>
    %58 = arith.addf %56, %57 : vector<16x32xf32>
    %cst_39 = arith.constant 5.000000e-01 : f32
    %59 = vector.broadcast %cst_39 : f32 to vector<16x32xf32>
    %60 = arith.mulf %59, %58 : vector<16x32xf32>
    %cst_40 = arith.constant 0.707106769 : f32
    %61 = vector.broadcast %cst_40 : f32 to vector<16x32xf32>
    %62 = arith.mulf %58, %61 : vector<16x32xf32>
    %63 = math.erf %62 : vector<16x32xf32>
    %cst_41 = arith.constant 1.000000e+00 : f32
    %64 = vector.broadcast %cst_41 : f32 to vector<16x32xf32>
    %65 = arith.addf %64, %63 : vector<16x32xf32>
    %66 = arith.mulf %60, %65 : vector<16x32xf32>
    %c0_42 = arith.constant 0 : index
    %c0_43 = arith.constant 0 : index
    %67 = vector.load %arg12[%c0_42, %c0_43] : memref<32x128xf32, #tpu.memory_space<vmem>>, vector<32x128xf32>
    %cst_44 = arith.constant dense<0.000000e+00> : vector<16x128xf32>
    %68 = tpu.matmul %66, %67, %cst_44 {dimension_numbers = #tpu.dot_dimension_numbers<[1], [0], [0], [1], [0, 0, 1, 1], [], []>} : vector<16x32xf32>, vector<32x128xf32>, vector<16x128xf32> -> vector<16x128xf32>
    %69 = vector.broadcast %5 : vector<1x128xf32> to vector<16x128xf32>
    %70 = arith.addf %68, %69 : vector<16x128xf32>
    %c0_45 = arith.constant 0 : index
    %c0_46 = arith.constant 0 : index
    %71 = vector.load %arg14[%c0_45, %c0_46] : memref<16x128xf32, #tpu.memory_space<vmem>>, vector<16x128xf32>
    tpu.vector_store %arg14[%c0_45, %c0_46], %70 {strides = array<i32>} : memref<16x128xf32, #tpu.memory_space<vmem>>, vector<16x128xf32>,
    return
  }
  func.func @transform_0(%arg0: i32) -> (i32, i32) {
    %c0_i32 = arith.constant 0 : i32
    %c0_i32_0 = arith.constant 0 : i32
    return %arg0, %c0_i32 : i32, i32
  }
  func.func @transform_1(%arg0: i32) -> (i32, i32) {
    %c0_i32 = arith.constant 0 : i32
    %c0_i32_0 = arith.constant 0 : i32
    %c0_i32_1 = arith.constant 0 : i32
    return %c0_i32, %c0_i32_0 : i32, i32
  }
  func.func @transform_2(%arg0: i32) -> (i32, i32) {
    %c0_i32 = arith.constant 0 : i32
    %c0_i32_0 = arith.constant 0 : i32
    %c0_i32_1 = arith.constant 0 : i32
    return %c0_i32, %c0_i32_0 : i32, i32
  }
  func.func @transform_3(%arg0: i32) -> (i32, i32) {
    %c0_i32 = arith.constant 0 : i32
    %c0_i32_0 = arith.constant 0 : i32
    %c0_i32_1 = arith.constant 0 : i32
    return %c0_i32, %c0_i32_0 : i32, i32
  }
  func.func @transform_4(%arg0: i32) -> (i32, i32) {
    %c0_i32 = arith.constant 0 : i32
    %c0_i32_0 = arith.constant 0 : i32
    %c0_i32_1 = arith.constant 0 : i32
    return %c0_i32, %c0_i32_0 : i32, i32
  }
  func.func @transform_5(%arg0: i32) -> (i32, i32) {
    %c0_i32 = arith.constant 0 : i32
    %c0_i32_0 = arith.constant 0 : i32
    %c0_i32_1 = arith.constant 0 : i32
    return %c0_i32, %c0_i32_0 : i32, i32
  }
  func.func @transform_6(%arg0: i32) -> (i32, i32) {
    %c0_i32 = arith.constant 0 : i32
    %c0_i32_0 = arith.constant 0 : i32
    %c0_i32_1 = arith.constant 0 : i32
    return %c0_i32, %c0_i32_0 : i32, i32
  }
  func.func @transform_7(%arg0: i32) -> (i32, i32) {
    %c0_i32 = arith.constant 0 : i32
    %c0_i32_0 = arith.constant 0 : i32
    %c0_i32_1 = arith.constant 0 : i32
    return %c0_i32, %c0_i32_0 : i32, i32
  }
  func.func @transform_8(%arg0: i32) -> (i32, i32) {
    %c0_i32 = arith.constant 0 : i32
    %c0_i32_0 = arith.constant 0 : i32
    %c0_i32_1 = arith.constant 0 : i32
    return %c0_i32, %c0_i32_0 : i32, i32
  }
  func.func @transform_9(%arg0: i32) -> (i32, i32) {
    %c0_i32 = arith.constant 0 : i32
    %c0_i32_0 = arith.constant 0 : i32
    %c0_i32_1 = arith.constant 0 : i32
    return %c0_i32, %c0_i32_0 : i32, i32
  }
  func.func @transform_10(%arg0: i32) -> (i32, i32) {
    %c0_i32 = arith.constant 0 : i32
    %c0_i32_0 = arith.constant 0 : i32
    %c0_i32_1 = arith.constant 0 : i32
    return %c0_i32, %c0_i32_0 : i32, i32
  }
  func.func @transform_11(%arg0: i32) -> (i32, i32) {
    %c0_i32 = arith.constant 0 : i32
    %c0_i32_0 = arith.constant 0 : i32
    %c0_i32_1 = arith.constant 0 : i32
    return %c0_i32, %c0_i32_0 : i32, i32
  }
  func.func @transform_12(%arg0: i32) -> (i32, i32) {
    %c0_i32 = arith.constant 0 : i32
    %c0_i32_0 = arith.constant 0 : i32
    %c0_i32_1 = arith.constant 0 : i32
    return %c0_i32, %c0_i32_0 : i32, i32
  }
  func.func @transform_13(%arg0: i32) -> (i32, i32) {
    %c0_i32 = arith.constant 0 : i32
    %c0_i32_0 = arith.constant 0 : i32
    return %arg0, %c0_i32 : i32, i32
  }
}

</mosaic_0001>

<bundles_post_ra>
// kernel: tpu_custom_call.1
= control target key start
LH: loop header
LB: loop body
LE: loop exit
PB: predicated region body
PF: predicated region fallthrough
CT: control target
= control target key end

     0   :  { %18 = vsyncpa [#allocation3], 0  ;;  %s2641_s0 = inlined_call_operand.hbm [shape: f32[16,128], index: 0, kind: input, shape index: {}]   ;;  %s2642_s1 = inlined_call_operand.hbm [shape: f32[128,512], index: 1, kind: input, shape index: {}]   ;;  %s2643_s2 = inlined_call_operand.vmem [shape: f32[1,512], index: 2, kind: input, shape index: {}]   ;;  %s2644_s3 = inlined_call_operand.hbm [shape: f32[512,256], index: 3, kind: input, shape index: {}]   ;;  %s2645_s4 = inlined_call_operand.hbm [shape: f32[1,256], index: 4, kind: input, shape index: {}]   ;;  %s2646_s5 = inlined_call_operand.vmem [shape: f32[256,128], index: 5, kind: input, shape index: {}]   ;;  %s2647_s6 = inlined_call_operand.hbm [shape: f32[1,128], index: 6, kind: input, shape index: {}]   ;;  %s2648_s7 = inlined_call_operand.vmem [shape: f32[128,64], index: 7, kind: input, shape index: {}]   ;;  %s2649_s8 = inlined_call_operand.vmem [shape: f32[1,64], index: 8, kind: input, shape index: {}]   ;;  %s2650_s9 = inlined_call_operand.vmem [shape: f32[64,32], index: 9, kind: input, shape index: {}]   ;;  %s2651_s10 = inlined_call_operand.vmem [shape: f32[1,32], index: 10, kind: input, shape index: {}]   ;;  %s2652_s11 = inlined_call_operand.vmem [shape: f32[32,128], index: 11, kind: input, shape index: {}]   ;;  %s2653_s12 = inlined_call_operand.vmem [shape: f32[1,128], index: 12, kind: input, shape index: {}]   ;;  %s2654_s13 = inlined_call_operand.hbm [shape: f32[16,128], index: 13, kind: output, shape index: {}]  }
   0x1   :  { %19 = vsyncpa [#allocation6], 0 }
   0x2   :  { %20 = vsyncpa [#allocation9], 0  ;;  %s39_s27 = sshll.u32 %s2642_s1, 4  ;;  %s40_s27 = int_to_ptr.hbm [resolvable:$true] %s39_s27 }
   0x3   :  { %21 = vsyncpa [#allocation4], 0  ;;  %s1851_s28 = smov [#allocation5]   ;;  %s68_s15 = sshll.u32 %s2645_s4, 4  ;;  %s69_s15 = int_to_ptr.hbm [resolvable:$true] %s68_s15 }
   0x4   :  { %s41_s29 = sshll.u32 %s1851_s28, 4  ;;  %s1852_s16 = smov 512   ;;  %s42_s29 = int_to_ptr.vmem [resolvable:$true] %s41_s29 }
   0x5   :  { %s1853_s17 = smov 32   ;;  %s1854_s18 = smov [#allocation8]  }
   0x6   :  { %47 = dma.hbm_to_vmem [thread:$0]  %s40_s27, 8192, %s42_s29, [#allocation6], %s1852_s16, %s1852_s16, %s1853_s17  }
   0x7   :  { %s70_s19 = sshll.u32 %s1854_s18, 4  ;;  %s26_s22 = sshll.u32 %s2641_s0, 4  ;;  %s71_s19 = int_to_ptr.vmem [resolvable:$true] %s70_s19  ;;  %s27_s22 = int_to_ptr.hbm [resolvable:$true] %s26_s22 }
   0x8   :  { %73 = dma.hbm_to_vmem [thread:$0]  %s69_s15, 32, %s71_s19, [#allocation9]  }
   0x9   :  { %s1855_s1 = smov [#allocation2]   ;;  %s54_s4 = sshll.u32 %s2644_s3, 4  ;;  %s55_s4 = int_to_ptr.hbm [resolvable:$true] %s54_s4 }
   0xa   :  { %s28_s23 = sshll.u32 %s1855_s1, 4  ;;  %s1856_s26 = smov 128   ;;  %s29_s23 = int_to_ptr.vmem [resolvable:$true] %s28_s23 }
   0xb   :  { %s1857_s28 = smov 8   ;;  %s1858_s27 = smov [#allocation7]  }
   0xc   :  { %34 = dma.hbm_to_vmem [thread:$0]  %s27_s22, 256, %s29_s23, [#allocation3], %s1856_s26, %s1856_s26, %s1857_s28  }
   0xd   :  { %s56_s29 = sshll.u32 %s1858_s27, 4  ;;  %s1859_s0 = smov 256   ;;  %s57_s29 = int_to_ptr.vmem [resolvable:$true] %s56_s29 }
   0xe   :  { %s1860_s30 = smov 16   ;;  %s81_s16 = sshll.u32 %s2647_s6, 4  ;;  %s82_s16 = int_to_ptr.hbm [resolvable:$true] %s81_s16 }
   0xf   :  { %62 = dma.hbm_to_vmem [thread:$0]  %s55_s4, 16384, %s57_s29, [#allocation6], %s1859_s0, %s1859_s0, %s1860_s30  }
  0x10   :  { %s1861_s17 = smov [#allocation10]  }
  0x11   :  { %s83_s3 = sshll.u32 %s1861_s17, 4  ;;  %s84_s3 = int_to_ptr.vmem [resolvable:$true] %s83_s3 }
  0x12   :  { %86 = dma.hbm_to_vmem [thread:$0]  %s82_s16, 16, %s84_s3, [#allocation9]  }
  0x13   :  { %1843 = dma.done.wait [#allocation3], 256  }
  0x14   :  { %1844 = vsyncadd [#allocation3], 4294967040 }
  0x15   :  { %1845 = dma.done.wait [#allocation6], 24576  }
  0x16   :  { %1846 = vsyncadd [#allocation6], 4294942720 }
  0x17   :  { %1847 = dma.done.wait [#allocation9], 48  }
  0x18   :  { %1848 = vsyncadd [#allocation9], 4294967248  ;;  %v187_v0 = vld [vmem:[#allocation5 + $0x1e0] sm:$0xff]  ;;  %v188_v1 = vld [vmem:[#allocation5 + $0x1e8] sm:$0xff]  ;;  %s1862_s0 = smov [#allocation11]   ;;  %s1610_s15 = sshll.u32 %s2654_s13, 4  ;;  %s1611_s15 = int_to_ptr.hbm [resolvable:$true] %s1610_s15 }
  0x19   :  { %v189_v2 = vld [vmem:[#allocation5 + $0x1f0] sm:$0xff]  ;;  %200 = vmatpush.msra.mxu0 %v187_v0  ;;  %223 = vmatpush.msra.mxu1 %v188_v1  ;;  %v190_v3 = vld [vmem:[#allocation5 + $0x1f8] sm:$0xff]  ;;  %v183_v4 = vld [vmem:[#allocation5 + $0x1c0] sm:$0xff] }
  0x1a   :  { %v184_v5 = vld [vmem:[#allocation5 + $0x1c8] sm:$0xff]  ;;  %246 = vmatpush.msra.mxu2 %v189_v2  ;;  %269 = vmatpush.msra.mxu3 %v190_v3  ;;  %v185_v6 = vld [vmem:[#allocation5 + $0x1d0] sm:$0xff]  ;;  %v186_v7 = vld [vmem:[#allocation5 + $0x1d8] sm:$0xff] }
  0x1b   :  { %v179_v8 = vld [vmem:[#allocation5 + $0x1a0] sm:$0xff]  ;;  %201 = vmatpush.msra.mxu0 %v183_v4  ;;  %224 = vmatpush.msra.mxu1 %v184_v5  ;;  %v180_v9 = vld [vmem:[#allocation5 + $0x1a8] sm:$0xff]  ;;  %v181_v10 = vld [vmem:[#allocation5 + $0x1b0] sm:$0xff] }
  0x1c   :  { %v182_v11 = vld [vmem:[#allocation5 + $0x1b8] sm:$0xff]  ;;  %247 = vmatpush.msra.mxu2 %v185_v6  ;;  %270 = vmatpush.msra.mxu3 %v186_v7  ;;  %v175_v12 = vld [vmem:[#allocation5 + $0x180] sm:$0xff]  ;;  %v176_v13 = vld [vmem:[#allocation5 + $0x188] sm:$0xff] }
  0x1d   :  { %202 = vmatpush.msra.mxu0 %v179_v8  ;;  %225 = vmatpush.msra.mxu1 %v180_v9  ;;  %v177_v14 = vld [vmem:[#allocation5 + $0x190] sm:$0xff]  ;;  %v178_v15 = vld [vmem:[#allocation5 + $0x198] sm:$0xff]  ;;  %v171_v16 = vld [vmem:[#allocation5 + $0x160] sm:$0xff] }
  0x1e   :  { %248 = vmatpush.msra.mxu2 %v181_v10  ;;  %271 = vmatpush.msra.mxu3 %v182_v11  ;;  %v172_v17 = vld [vmem:[#allocation5 + $0x168] sm:$0xff]  ;;  %v173_v18 = vld [vmem:[#allocation5 + $0x170] sm:$0xff]  ;;  %v174_v19 = vld [vmem:[#allocation5 + $0x178] sm:$0xff] }
  0x1f   :  { %203 = vmatpush.msra.mxu0 %v175_v12  ;;  %226 = vmatpush.msra.mxu1 %v176_v13  ;;  %v167_v20 = vld [vmem:[#allocation5 + $0x140] sm:$0xff]  ;;  %v168_v21 = vld [vmem:[#allocation5 + $0x148] sm:$0xff]  ;;  %v169_v22 = vld [vmem:[#allocation5 + $0x150] sm:$0xff] }
  0x20   :  { %249 = vmatpush.msra.mxu2 %v177_v14  ;;  %272 = vmatpush.msra.mxu3 %v178_v15  ;;  %v170_v23 = vld [vmem:[#allocation5 + $0x158] sm:$0xff]  ;;  %v163_v24 = vld [vmem:[#allocation5 + $0x120] sm:$0xff]  ;;  %v164_v25 = vld [vmem:[#allocation5 + $0x128] sm:$0xff] }
  0x21   :  { %204 = vmatpush.msra.mxu0 %v171_v16  ;;  %227 = vmatpush.msra.mxu1 %v172_v17  ;;  %v165_v26 = vld [vmem:[#allocation5 + $0x130] sm:$0xff]  ;;  %v166_v27 = vld [vmem:[#allocation5 + $0x138] sm:$0xff]  ;;  %v159_v28 = vld [vmem:[#allocation5 + $0x100] sm:$0xff] }
  0x22   :  { %250 = vmatpush.msra.mxu2 %v173_v18  ;;  %273 = vmatpush.msra.mxu3 %v174_v19  ;;  %v160_v29 = vld [vmem:[#allocation5 + $0x108] sm:$0xff]  ;;  %v161_v30 = vld [vmem:[#allocation5 + $0x110] sm:$0xff]  ;;  %v162_v31 = vld [vmem:[#allocation5 + $0x118] sm:$0xff] }
  0x23   :  { %205 = vmatpush.msra.mxu0 %v167_v20  ;;  %228 = vmatpush.msra.mxu1 %v168_v21  ;;  %v155_v32 = vld [vmem:[#allocation5 + $0xe0] sm:$0xff]  ;;  %v156_v33 = vld [vmem:[#allocation5 + $0xe8] sm:$0xff]  ;;  %v157_v34 = vld [vmem:[#allocation5 + $0xf0] sm:$0xff] }
  0x24   :  { %251 = vmatpush.msra.mxu2 %v169_v22  ;;  %274 = vmatpush.msra.mxu3 %v170_v23  ;;  %v158_v35 = vld [vmem:[#allocation5 + $0xf8] sm:$0xff]  ;;  %v151_v36 = vld [vmem:[#allocation5 + $0xc0] sm:$0xff]  ;;  %v152_v37 = vld [vmem:[#allocation5 + $0xc8] sm:$0xff] }
  0x25   :  { %206 = vmatpush.msra.mxu0 %v163_v24  ;;  %229 = vmatpush.msra.mxu1 %v164_v25  ;;  %v153_v38 = vld [vmem:[#allocation5 + $0xd0] sm:$0xff]  ;;  %v154_v39 = vld [vmem:[#allocation5 + $0xd8] sm:$0xff]  ;;  %v147_v40 = vld [vmem:[#allocation5 + $0xa0] sm:$0xff] }
  0x26   :  { %252 = vmatpush.msra.mxu2 %v165_v26  ;;  %275 = vmatpush.msra.mxu3 %v166_v27  ;;  %v148_v41 = vld [vmem:[#allocation5 + $0xa8] sm:$0xff]  ;;  %v149_v42 = vld [vmem:[#allocation5 + $0xb0] sm:$0xff]  ;;  %v150_v43 = vld [vmem:[#allocation5 + $0xb8] sm:$0xff] }
  0x27   :  { %207 = vmatpush.msra.mxu0 %v159_v28  ;;  %230 = vmatpush.msra.mxu1 %v160_v29  ;;  %v143_v44 = vld [vmem:[#allocation5 + $0x80] sm:$0xff]  ;;  %v144_v45 = vld [vmem:[#allocation5 + $0x88] sm:$0xff]  ;;  %v145_v46 = vld [vmem:[#allocation5 + $0x90] sm:$0xff] }
  0x28   :  { %253 = vmatpush.msra.mxu2 %v161_v30  ;;  %276 = vmatpush.msra.mxu3 %v162_v31  ;;  %v146_v47 = vld [vmem:[#allocation5 + $0x98] sm:$0xff]  ;;  %v139_v48 = vld [vmem:[#allocation5 + $0x60] sm:$0xff]  ;;  %v140_v49 = vld [vmem:[#allocation5 + $0x68] sm:$0xff] }
  0x29   :  { %208 = vmatpush.msra.mxu0 %v155_v32  ;;  %231 = vmatpush.msra.mxu1 %v156_v33  ;;  %v141_v50 = vld [vmem:[#allocation5 + $0x70] sm:$0xff]  ;;  %v142_v51 = vld [vmem:[#allocation5 + $0x78] sm:$0xff]  ;;  %v135_v52 = vld [vmem:[#allocation5 + $0x40] sm:$0xff] }
  0x2a   :  { %254 = vmatpush.msra.mxu2 %v157_v34  ;;  %277 = vmatpush.msra.mxu3 %v158_v35  ;;  %v136_v53 = vld [vmem:[#allocation5 + $0x48] sm:$0xff]  ;;  %v137_v54 = vld [vmem:[#allocation5 + $0x50] sm:$0xff]  ;;  %v138_v55 = vld [vmem:[#allocation5 + $0x58] sm:$0xff] }
  0x2b   :  { %209 = vmatpush.msra.mxu0 %v151_v36  ;;  %232 = vmatpush.msra.mxu1 %v152_v37  ;;  %v131_v56 = vld [vmem:[#allocation5 + $0x20] sm:$0xff]  ;;  %v132_v57 = vld [vmem:[#allocation5 + $0x28] sm:$0xff]  ;;  %v133_v58 = vld [vmem:[#allocation5 + $0x30] sm:$0xff] }
  0x2c   :  { %255 = vmatpush.msra.mxu2 %v153_v38  ;;  %278 = vmatpush.msra.mxu3 %v154_v39  ;;  %v134_v59 = vld [vmem:[#allocation5 + $0x38] sm:$0xff]  ;;  %v127_v60 = vld [vmem:[#allocation5] sm:$0xff]  ;;  %v128_v61 = vld [vmem:[#allocation5 + $0x8] sm:$0xff] }
  0x2d   :  { %210 = vmatpush.msra.mxu0 %v147_v40  ;;  %233 = vmatpush.msra.mxu1 %v148_v41  ;;  %v129_v62 = vld [vmem:[#allocation5 + $0x10] sm:$0xff]  ;;  %v130_v63 = vld [vmem:[#allocation5 + $0x18] sm:$0xff]  ;;  %v672_v17 = vld [vmem:[#allocation7 + $0xe0] sm:$0xff] }
  0x2e   :  { %256 = vmatpush.msra.mxu2 %v149_v42  ;;  %279 = vmatpush.msra.mxu3 %v150_v43  ;;  %v125_v0 = vld [vmem:[#allocation2] sm:$0xff]  ;;  %v126_v1 = vld [vmem:[#allocation2 + $0x8] sm:$0xff]  ;;  %v704_v18 = vld [vmem:[#allocation7 + $0x1e0] sm:$0xff] }
  0x2f   :  { %211 = vmatpush.msra.mxu0 %v143_v44  ;;  %234 = vmatpush.msra.mxu1 %v144_v45  ;;  %v1954_v2 = vld [vmem:[%s2643_s2] sm:$0xf]  ;;  %v668_v38 = vld [vmem:[#allocation7 + $0xc0] sm:$0xff] }
  0x30   :  { %257 = vmatpush.msra.mxu2 %v145_v46  ;;  %280 = vmatpush.msra.mxu3 %v146_v47  ;;  %v192_v3 = vperm.slane %v1954_v2, 0  ;;  %v193_v4 = vperm.slane %v1954_v2, 1  ;;  %v194_v11 = vperm.slane %v1954_v2, 2  ;;  %v195_v12 = vperm.slane %v1954_v2, 3  ;;  %v674_v13 = vld [vmem:[#allocation7 + $0xf0] sm:$0xff]  ;;  %v700_v42 = vld [vmem:[#allocation7 + $0x1c0] sm:$0xff] }
  0x31   :  { %212 = vmatpush.msra.mxu0 %v139_v48  ;;  %235 = vmatpush.msra.mxu1 %v140_v49  ;;  %v706_v14 = vld [vmem:[#allocation7 + $0x1f0] sm:$0xff] }
  0x32   :  { %258 = vmatpush.msra.mxu2 %v141_v50  ;;  %281 = vmatpush.msra.mxu3 %v142_v51  ;;  %v670_v25 = vld [vmem:[#allocation7 + $0xd0] sm:$0xff]  ;;  %v736_v50 = vld [vmem:[#allocation7 + $0x2e0] sm:$0xff] }
  0x33   :  { %213 = vmatpush.msra.mxu0 %v135_v52  ;;  %236 = vmatpush.msra.mxu1 %v136_v53  ;;  %v702_v26 = vld [vmem:[#allocation7 + $0x1d0] sm:$0xff] }
  0x34   :  { %259 = vmatpush.msra.mxu2 %v137_v54  ;;  %282 = vmatpush.msra.mxu3 %v138_v55  ;;  %v738_v43 = vld [vmem:[#allocation7 + $0x2f0] sm:$0xff] }
  0x35   :  { %214 = vmatpush.msra.mxu0 %v131_v56  ;;  %237 = vmatpush.msra.mxu1 %v132_v57  ;;  %v770_v44 = vld [vmem:[#allocation7 + $0x3f0] sm:$0xff] }
  0x36   :  { %260 = vmatpush.msra.mxu2 %v133_v58  ;;  %283 = vmatpush.msra.mxu3 %v134_v59  ;;  %v666_v48 = vld [vmem:[#allocation7 + $0xb0] sm:$0xff] }
  0x37   :  { %215 = vmatpush.msra.mxu0 %v127_v60  ;;  %238 = vmatpush.msra.mxu1 %v128_v61  ;;  %v698_v49 = vld [vmem:[#allocation7 + $0x1b0] sm:$0xff] }
  0x38   :  { %261 = vmatpush.msra.mxu2 %v129_v62  ;;  %284 = vmatpush.msra.mxu3 %v130_v63  ;;  %v768_v62 = vld [vmem:[#allocation7 + $0x3e0] sm:$0xff]  ;;  %v650_v2 = vld [vmem:[#allocation7 + $0x30] sm:$0xff] }
  0x39   :  { %216 = vmatmul.f32.vlgmr.msra.gmra.mxu0 %v125_v0  ;;  %239 = vmatmul.f32.vlgmr.msra.gmra.mxu1 %v125_v0  ;;  %v664_v63 = vld [vmem:[#allocation7 + $0xa0] sm:$0xff] }
  0x3a   :  { %262 = vmatmul.f32.vlgmr.msra.gmra.mxu2 %v125_v0  ;;  %285 = vmatmul.f32.vlgmr.msra.gmra.mxu3 %v125_v0  ;;  %v696_v0 = vld [vmem:[#allocation7 + $0x1a0] sm:$0xff] }
  0x3b   :  { %777 = vmatpush.msrb.mxu0 %v674_v13  ;;  %800 = vmatpush.msrb.mxu1 %v706_v14  ;;  %v734_v13 = vld [vmem:[#allocation7 + $0x2d0] sm:$0xff] }
  0x3c   :  { %823 = vmatpush.msrb.mxu2 %v738_v43  ;;  %846 = vmatpush.msrb.mxu3 %v770_v44 }
  0x3d   :  { %778 = vmatpush.msrb.mxu0 %v672_v17  ;;  %801 = vmatpush.msrb.mxu1 %v704_v18 }
  0x3e   :  { %824 = vmatpush.msrb.mxu2 %v736_v50  ;;  %847 = vmatpush.msrb.mxu3 %v768_v62  ;;  %v728_v62 = vld [vmem:[#allocation7 + $0x2a0] sm:$0xff] }
  0x3f   :  { %779 = vmatpush.msrb.mxu0 %v670_v25  ;;  %802 = vmatpush.msrb.mxu1 %v702_v26  ;;  %v766_v26 = vld [vmem:[#allocation7 + $0x3d0] sm:$0xff] }
  0x40   :  { %825 = vmatpush.msrb.mxu2 %v734_v13  ;;  %848 = vmatpush.msrb.mxu3 %v766_v26  ;;  %v688_v13 = vld [vmem:[#allocation7 + $0x160] sm:$0xff] }
  0x41   :  { %219 = vmatmul.f32.gmra.mxu0 %v126_v1  ;;  %242 = vmatmul.f32.gmra.mxu1 %v126_v1 }
  0x42   :  { %265 = vmatmul.f32.gmra.mxu2 %v126_v1  ;;  %288 = vmatmul.f32.gmra.mxu3 %v126_v1 }
  0x43   :  { %780 = vmatpush.msrb.mxu0 %v668_v38  ;;  %803 = vmatpush.msrb.mxu1 %v700_v42 }
  0x45   :  { %781 = vmatpush.msrb.mxu0 %v666_v48  ;;  %804 = vmatpush.msrb.mxu1 %v698_v49  ;;  %v692_v48 = vld [vmem:[#allocation7 + $0x180] sm:$0xff]  ;;  %v730_v49 = vld [vmem:[#allocation7 + $0x2b0] sm:$0xff] }
  0x47   :  { %782 = vmatpush.msrb.mxu0 %v664_v63  ;;  %805 = vmatpush.msrb.mxu1 %v696_v0 }
  0xb6   :  { %v217_v5 = vpop.f32.mrf.mxu0  ;;  %v240_v6 = vpop.f32.mrf.mxu1 }
  0xb7   :  { %v1960_v7 = vadd.f32 %v217_v5, %v192_v3  ;;  %v1964_v8 = vadd.f32 %v240_v6, %v193_v4 }
  0xb9   :  { %v1967_v9 = vmul.f32 0.70710677, %v1960_v7  ;;  %v1970_v10 = vmul.f32 0.70710677, %v1964_v8 }
  0xbb   :  { %v308_v15 = vmul.f32 %v1967_v9, %v1967_v9  ;;  %v348_v16 = vmul.f32 %v1970_v10, %v1970_v10 }
  0xbd   :  { %v1978_v19 = vmin.f32 %v308_v15, 16.0  ;;  %v1980_v20 = vmin.f32 %v348_v16, 16.0  ;;  %v263_v21 = vpop.f32.mrf.mxu2  ;;  %v286_v22 = vpop.f32.mrf.mxu3 }
  0xbe   :  { %v1984_v23 = vadd.f32 %v263_v21, %v194_v11  ;;  %v1988_v24 = vadd.f32 %v286_v22, %v195_v12  ;;  %v220_v57 = vpop.f32.mrf.mxu0 }
  0xbf   :  { %v310_v27 = vmul.f32 2.1237322e-06, %v1978_v19  ;;  %v321_v28 = vmul.f32 3.8918573e-05, %v1978_v19  ;;  %v350_v29 = vmul.f32 2.1237322e-06, %v1980_v20  ;;  %v2020_v17 = vadd.f32 %v220_v57, %v192_v3 }
  0xc0   :  { %v361_v30 = vmul.f32 3.8918573e-05, %v1980_v20  ;;  %v1995_v31 = vmul.f32 0.70710677, %v1984_v23  ;;  %v2000_v37 = vmul.f32 0.70710677, %v1988_v24 }
  0xc1   :  { %v311_v32 = vadd.f32 0.00028619796, %v310_v27  ;;  %v322_v33 = vadd.f32 0.001143296, %v321_v28  ;;  %v351_v34 = vadd.f32 0.00028619796, %v350_v29 }
  0xc2   :  { %v362_v35 = vadd.f32 0.001143296, %v361_v30  ;;  %v388_v36 = vmul.f32 %v1995_v31, %v1995_v31  ;;  %v428_v47 = vmul.f32 %v2000_v37, %v2000_v37  ;;  %v662_v27 = vld [vmem:[#allocation7 + $0x90] sm:$0xff] }
  0xc3   :  { %v312_v39 = vmul.f32 %v311_v32, %v1978_v19  ;;  %v323_v40 = vmul.f32 %v322_v33, %v1978_v19  ;;  %v352_v41 = vmul.f32 %v351_v34, %v1980_v20  ;;  %783 = vmatpush.msrb.mxu0 %v662_v27  ;;  %v694_v32 = vld [vmem:[#allocation7 + $0x190] sm:$0xff]  ;;  %v732_v33 = vld [vmem:[#allocation7 + $0x2c0] sm:$0xff] }
  0xc4   :  { %v363_v45 = vmul.f32 %v362_v35, %v1980_v20  ;;  %v2006_v46 = vmin.f32 %v388_v36, 16.0  ;;  %v2015_v61 = vmin.f32 %v428_v47, 16.0  ;;  %v764_v34 = vld [vmem:[#allocation7 + $0x3c0] sm:$0xff]  ;;  %806 = vmatpush.msrb.mxu1 %v694_v32  ;;  %826 = vmatpush.msrb.mxu2 %v732_v33  ;;  %v686_v27 = vld [vmem:[#allocation7 + $0x150] sm:$0xff] }
  0xc5   :  { %v313_v51 = vadd.f32 0.0036580483, %v312_v39  ;;  %v324_v52 = vadd.f32 0.014752088, %v323_v40  ;;  %v353_v53 = vadd.f32 0.0036580483, %v352_v41  ;;  %849 = vmatpush.msrb.mxu3 %v764_v34  ;;  %v266_v26 = vpop.f32.mrf.mxu2 }
  0xc6   :  { %v364_v54 = vadd.f32 0.014752088, %v363_v45  ;;  %v390_v55 = vmul.f32 2.1237322e-06, %v2006_v46  ;;  %v401_v56 = vmul.f32 3.8918573e-05, %v2006_v46  ;;  %807 = vmatpush.msrb.mxu1 %v692_v48  ;;  %827 = vmatpush.msrb.mxu2 %v730_v49 }
  0xc7   :  { %v314_v58 = vmul.f32 %v313_v51, %v1978_v19  ;;  %v325_v59 = vmul.f32 %v324_v52, %v1978_v19  ;;  %v354_v60 = vmul.f32 %v353_v53, %v1980_v20  ;;  %v430_v25 = vmul.f32 2.1237322e-06, %v2015_v61  ;;  %v660_v47 = vld [vmem:[#allocation7 + $0x80] sm:$0xff]  ;;  %v762_v52 = vld [vmem:[#allocation7 + $0x3b0] sm:$0xff] }
  0xc8   :  { %v365_v1 = vmul.f32 %v364_v54, %v1980_v20  ;;  %v391_v5 = vadd.f32 0.00028619796, %v390_v55  ;;  %v402_v6 = vadd.f32 0.001143296, %v401_v56  ;;  %v441_v3 = vmul.f32 3.8918573e-05, %v2015_v61  ;;  %784 = vmatpush.msrb.mxu0 %v660_v47  ;;  %850 = vmatpush.msrb.mxu3 %v762_v52 }
  0xc9   :  { %v315_v14 = vadd.f32 0.05243302, %v314_v58  ;;  %v326_v15 = vadd.f32 0.112945676, %v325_v59  ;;  %v355_v16 = vadd.f32 0.05243302, %v354_v60  ;;  %828 = vmatpush.msrb.mxu2 %v728_v62 }
  0xca   :  { %v366_v18 = vadd.f32 0.112945676, %v365_v1  ;;  %v392_v21 = vmul.f32 %v391_v5, %v2006_v46  ;;  %v403_v22 = vmul.f32 %v402_v6, %v2006_v46  ;;  %v431_v39 = vadd.f32 0.00028619796, %v430_v25  ;;  %v658_v53 = vld [vmem:[#allocation7 + $0x70] sm:$0xff]  ;;  %v760_v5 = vld [vmem:[#allocation7 + $0x3a0] sm:$0xff]  ;;  %v243_v25 = vpop.f32.mrf.mxu1 }
  0xcb   :  { %v316_v28 = vmul.f32 %v315_v14, %v1978_v19  ;;  %v327_v29 = vmul.f32 %v326_v15, %v1978_v19  ;;  %v356_v30 = vmul.f32 %v355_v16, %v1980_v20  ;;  %v442_v51 = vadd.f32 0.001143296, %v441_v3  ;;  %v690_v54 = vld [vmem:[#allocation7 + $0x170] sm:$0xff]  ;;  %785 = vmatpush.msrb.mxu0 %v658_v53  ;;  %v656_v6 = vld [vmem:[#allocation7 + $0x60] sm:$0xff]  ;;  %851 = vmatpush.msrb.mxu3 %v760_v5 }
  0xcc   :  { %v367_v35 = vmul.f32 %v366_v18, %v1980_v20  ;;  %v393_v36 = vadd.f32 0.0036580483, %v392_v21  ;;  %v404_v38 = vadd.f32 0.014752088, %v403_v22  ;;  %v432_v45 = vmul.f32 %v431_v39, %v2015_v61  ;;  %808 = vmatpush.msrb.mxu1 %v690_v54  ;;  %v726_v15 = vld [vmem:[#allocation7 + $0x290] sm:$0xff]  ;;  %v684_v39 = vld [vmem:[#allocation7 + $0x140] sm:$0xff] }
  0xcd   :  { %v317_v40 = vadd.f32 0.18741608, %v316_v28  ;;  %v328_v41 = vadd.f32 0.4994258, %v327_v29  ;;  %v357_v42 = vadd.f32 0.18741608, %v356_v30  ;;  %786 = vmatpush.msrb.mxu0 %v656_v6  ;;  %829 = vmatpush.msrb.mxu2 %v726_v15  ;;  %v289_v30 = vpop.f32.mrf.mxu3 }
  0xce   :  { %v368_v43 = vadd.f32 0.4994258, %v367_v35  ;;  %v405_v44 = vmul.f32 %v404_v38, %v2006_v46  ;;  %v394_v56 = vmul.f32 %v393_v36, %v2006_v46  ;;  %v2036_v58 = vmul.f32 0.70710677, %v2020_v17  ;;  %v758_v16 = vld [vmem:[#allocation7 + $0x390] sm:$0xff]  ;;  %809 = vmatpush.msrb.mxu1 %v688_v13  ;;  %v724_v28 = vld [vmem:[#allocation7 + $0x280] sm:$0xff] }
  0xcf   :  { %v329_v50 = vmul.f32 %v328_v41, %v1978_v19  ;;  %v318_v59 = vmul.f32 %v317_v40, %v1978_v19  ;;  %v433_v1 = vadd.f32 0.0036580483, %v432_v45  ;;  %v358_v14 = vmul.f32 %v357_v42, %v1980_v20  ;;  %v654_v18 = vld [vmem:[#allocation7 + $0x50] sm:$0xff]  ;;  %852 = vmatpush.msrb.mxu3 %v758_v16  ;;  %830 = vmatpush.msrb.mxu2 %v724_v28  ;;  %v652_v38 = vld [vmem:[#allocation7 + $0x40] sm:$0xff] }
  0xd0   :  { %v369_v55 = vmul.f32 %v368_v43, %v1980_v20  ;;  %v406_v57 = vadd.f32 0.112945676, %v405_v44  ;;  %v443_v19 = vmul.f32 %v442_v51, %v2015_v61  ;;  %v395_v21 = vadd.f32 0.05243302, %v394_v56  ;;  %v756_v20 = vld [vmem:[#allocation7 + $0x380] sm:$0xff]  ;;  %787 = vmatpush.msrb.mxu0 %v654_v18  ;;  %810 = vmatpush.msrb.mxu1 %v686_v27  ;;  %v754_v44 = vld [vmem:[#allocation7 + $0x370] sm:$0xff] }
  0xd1   :  { %v2039_v60 = vadd.f32 1.0, %v329_v50  ;;  %v468_v22 = vmul.f32 %v2036_v58, %v2036_v58  ;;  %v319_v29 = vadd.f32 1.1283791, %v318_v59  ;;  %v434_v32 = vmul.f32 %v433_v1, %v2015_v61  ;;  %853 = vmatpush.msrb.mxu3 %v756_v20  ;;  %v682_v52 = vld [vmem:[#allocation7 + $0x130] sm:$0xff]  ;;  %v720_v53 = vld [vmem:[#allocation7 + $0x260] sm:$0xff] }
  0xd2   :  { %v2041_v63 = vadd.f32 1.0, %v369_v55  ;;  %v407_v0 = vmul.f32 %v406_v57, %v2006_v46  ;;  %v359_v33 = vadd.f32 1.1283791, %v358_v14  ;;  %v444_v34 = vadd.f32 0.014752088, %v443_v19  ;;  %788 = vmatpush.msrb.mxu0 %v652_v38  ;;  %811 = vmatpush.msrb.mxu1 %v684_v39  ;;  %v752_v54 = vld [vmem:[#allocation7 + $0x360] sm:$0xff] }
  0xd3   :  { %1663 = vrcp.f32 %v2039_v60  ;;  %v2053_v35 = vadd.f32 %v243_v25, %v193_v4  ;;  %v2057_v36 = vadd.f32 %v266_v26, %v194_v11  ;;  %v396_v40 = vmul.f32 %v395_v21, %v2006_v46  ;;  %v722_v4 = vld [vmem:[#allocation7 + $0x270] sm:$0xff]  ;;  %854 = vmatpush.msrb.mxu3 %v754_v44  ;;  %v648_v62 = vld [vmem:[#allocation7 + $0x20] sm:$0xff]  ;;  %v699_v39 = vld [vmem:[#allocation7 + $0x1b8] sm:$0xff] }
  0xd4   :  { %1665 = vrcp.f32 %v2041_v63  ;;  %v408_v3 = vadd.f32 0.4994258, %v407_v0  ;;  %v2061_v42 = vmin.f32 %v468_v22, 16.0  ;;  %v2065_v43 = vadd.f32 %v289_v30, %v195_v12  ;;  %831 = vmatpush.msrb.mxu2 %v722_v4  ;;  %789 = vmatpush.msrb.mxu0 %v650_v2  ;;  %v680_v0 = vld [vmem:[#allocation7 + $0x120] sm:$0xff]  ;;  %v750_v6 = vld [vmem:[#allocation7 + $0x350] sm:$0xff]  ;;  %v707_v4 = vld [vmem:[#allocation7 + $0x1f8] sm:$0xff] }
  0xd5   :  { %v2070_v11 = vmul.f32 %v319_v29, %v1967_v9  ;;  %v340_v47 = vand.u32 2147483647, %v2039_v60  ;;  %v342_v48 = vand.u32 2147483648, %v2039_v60  ;;  %v445_v49 = vmul.f32 %v444_v34, %v2015_v61  ;;  %812 = vmatpush.msrb.mxu1 %v682_v52  ;;  %855 = vmatpush.msrb.mxu3 %v752_v54  ;;  %v646_v15 = vld [vmem:[#allocation7 + $0x10] sm:$0xff]  ;;  %v716_v18 = vld [vmem:[#allocation7 + $0x240] sm:$0xff]  ;;  %v701_v29 = vld [vmem:[#allocation7 + $0x1c8] sm:$0xff] }
  0xd6   :  { %v409_v41 = vmul.f32 %v408_v3, %v2006_v46  ;;  %vm336_vm0 = vweird.f32 %v2039_v60  ;;  %v435_v9 = vadd.f32 0.05243302, %v434_v32  ;;  %v2083_v55 = vmul.f32 %v359_v33, %v1970_v10  ;;  %832 = vmatpush.msrb.mxu2 %v720_v53  ;;  %790 = vmatpush.msrb.mxu0 %v648_v62  ;;  %v718_v10 = vld [vmem:[#allocation7 + $0x250] sm:$0xff]  ;;  %v748_v27 = vld [vmem:[#allocation7 + $0x340] sm:$0xff] }
  0xd7   :  { %v446_v57 = vadd.f32 0.112945676, %v445_v49  ;;  %v2088_v59 = vmul.f32 0.70710677, %v2053_v35  ;;  %v380_v5 = vand.u32 2147483647, %v2041_v63  ;;  %vm376_vm2 = vweird.f32 %v2041_v63  ;;  %813 = vmatpush.msrb.mxu1 %v680_v0  ;;  %856 = vmatpush.msrb.mxu3 %v750_v6 }
  0xd8   :  { %v2080_v51 = vadd.f32 1.0, %v409_v41  ;;  %v2096_v19 = vmul.f32 0.70710677, %v2057_v36  ;;  %833 = vmatpush.msrb.mxu2 %v718_v10  ;;  %v678_v16 = vld [vmem:[#allocation7 + $0x110] sm:$0xff]  ;;  %v382_v22 = vand.u32 2147483648, %v2041_v63  ;;  %v436_v26 = vmul.f32 %v435_v9, %v2015_v61  ;;  %791 = vmatpush.msrb.mxu0 %v646_v15  ;;  %v644_v28 = vld [vmem:[#allocation7] sm:$0xff] }
  0xd9   :  { %v2067_v45 = vpop.eup %1663  ;;  %v447_v14 = vmul.f32 %v446_v57, %v2015_v61  ;;  %v397_v25 = vadd.f32 0.18741608, %v396_v40  ;;  %v676_v20 = vld [vmem:[#allocation7 + $0x100] sm:$0xff]  ;;  %v508_v32 = vmul.f32 %v2088_v59, %v2088_v59  ;;  %814 = vmatpush.msrb.mxu1 %v678_v16  ;;  %v714_v33 = vld [vmem:[#allocation7 + $0x230] sm:$0xff]  ;;  %vm2114_vm5 = vcmp.eq.f32.partialorder %v340_v47, 8.507059e+37  ;;  %857 = vmatpush.msrb.mxu3 %v748_v27  ;;  %v675_v41 = vld [vmem:[#allocation7 + $0xf8] sm:$0xff] }
  0xda   :  { %v2075_v12 = vpop.eup %1665  ;;  %v332_v50 = vmul.f32 %v2067_v45, %v2039_v60  ;;  %vm337_vm1 = vweird.f32 %v2067_v45  ;;  %1667 = vrcp.f32 %v2080_v51  ;;  %834 = vmatpush.msrb.mxu2 %v716_v18  ;;  %v343_v60 = vor.u32 1.1754944e-38, %v342_v48  ;;  %792 = vmatpush.msrb.mxu0 %v644_v28  ;;  %v746_v40 = vld [vmem:[#allocation7 + $0x330] sm:$0xff]  ;;  %v712_v48 = vld [vmem:[#allocation7 + $0x220] sm:$0xff]  ;;  %v673_v9 = vld [vmem:[#allocation7 + $0xe8] sm:$0xff] }
  0xdb   :  { %v372_v56 = vmul.f32 %v2075_v12, %v2041_v63  ;;  %vm2105_vm3 = vmor %vm336_vm0, %vm337_vm1  ;;  %vm377_vm4 = vweird.f32 %v2075_v12  ;;  %v448_v3 = vadd.f32 0.4994258, %v447_v14  ;;  %vm2118_vm6 = vcmp.eq.f32.partialorder %v380_v5, 8.507059e+37  ;;  %815 = vmatpush.msrb.mxu1 %v676_v20  ;;  %858 = vmatpush.msrb.mxu3 %v746_v40  ;;  %v705_v0 = vld [vmem:[#allocation7 + $0x1e8] sm:$0xff]  ;;  %v710_v10 = vld [vmem:[#allocation7 + $0x210] sm:$0xff] }
  0xdc   :  { %v333_v1 = vsub.f32 1.0, %v332_v50  ;;  %v470_v2 = vmul.f32 2.1237322e-06, %v2061_v42  ;;  %v548_v47 = vmul.f32 %v2096_v19, %v2096_v19  ;;  %835 = vmatpush.msrb.mxu2 %v714_v33  ;;  %v744_v50 = vld [vmem:[#allocation7 + $0x320] sm:$0xff]  ;;  %vm2136_vm7 = vmor %vm376_vm2, %vm377_vm4  ;;  %v398_v57 = vmul.f32 %v397_v25, %v2006_v46  ;;  %869 = vmatpush.msra.mxu0 %v675_v41  ;;  %v742_v46 = vld [vmem:[#allocation7 + $0x310] sm:$0xff] }
  0xdd   :  { %v373_v13 = vsub.f32 1.0, %v372_v56  ;;  %v449_v49 = vmul.f32 %v448_v3, %v2015_v61  ;;  %v383_v56 = vor.u32 1.1754944e-38, %v382_v22  ;;  %v437_v62 = vadd.f32 0.18741608, %v436_v26  ;;  %892 = vmatpush.msra.mxu1 %v707_v4  ;;  %v671_v6 = vld [vmem:[#allocation7 + $0xd8] sm:$0xff]  ;;  %859 = vmatpush.msrb.mxu3 %v744_v50  ;;  %v708_v18 = vld [vmem:[#allocation7 + $0x200] sm:$0xff] }
  0xde   :  { %v334_v21 = vmul.f32 %v2067_v45, %v333_v1  ;;  %v2148_v5 = vmin.f32 %v508_v32, 16.0  ;;  %836 = vmatpush.msrb.mxu2 %v712_v48  ;;  %v2156_v16 = vmul.f32 0.70710677, %v2065_v43  ;;  %870 = vmatpush.msra.mxu0 %v673_v9  ;;  %v471_v22 = vadd.f32 0.00028619796, %v470_v2  ;;  %v740_v26 = vld [vmem:[#allocation7 + $0x300] sm:$0xff] }
  0xdf   :  { %v374_v30 = vmul.f32 %v2075_v12, %v373_v13  ;;  %v2153_v15 = vadd.f32 1.0, %v449_v49  ;;  %v2158_v25 = vmin.f32 %v548_v47, 16.0  ;;  %893 = vmatpush.msra.mxu1 %v705_v0  ;;  %v399_v27 = vadd.f32 1.1283791, %v398_v57  ;;  %860 = vmatpush.msrb.mxu3 %v742_v46  ;;  %v669_v20 = vld [vmem:[#allocation7 + $0xc8] sm:$0xff]  ;;  %v767_v0 = vld [vmem:[#allocation7 + $0x3d8] sm:$0xff] }
  0xe0   :  { %v335_v34 = vadd.f32 %v2067_v45, %v334_v21  ;;  %v2127_v52 = vpop.eup %1667  ;;  %837 = vmatpush.msrb.mxu2 %v710_v10  ;;  %v422_v28 = vand.u32 2147483648, %v2080_v51  ;;  %871 = vmatpush.msra.mxu0 %v671_v6  ;;  %v420_v32 = vand.u32 2147483647, %v2080_v51  ;;  %v510_v33 = vmul.f32 2.1237322e-06, %v2148_v5  ;;  %v737_v40 = vld [vmem:[#allocation7 + $0x2e8] sm:$0xff] }
  0xe1   :  { %v375_v44 = vadd.f32 %v2075_v12, %v374_v30  ;;  %v412_v63 = vmul.f32 %v2127_v52, %v2080_v51  ;;  %1669 = vrcp.f32 %v2153_v15  ;;  %v739_v30 = vld [vmem:[#allocation7 + $0x2f8] sm:$0xff]  ;;  %vm417_vm8 = vweird.f32 %v2127_v52  ;;  %861 = vmatpush.msrb.mxu3 %v740_v26  ;;  %v665_v47 = vld [vmem:[#allocation7 + $0xa8] sm:$0xff] }
  0xe2   :  { %v339_v53 = vsel %vm2105_vm3, %v2067_v45, %v335_v34  ;;  %838 = vmatpush.msrb.mxu2 %v708_v18  ;;  %v667_v34 = vld [vmem:[#allocation7 + $0xb8] sm:$0xff]  ;;  %v292_v38 = vmul.f32 0.5, %v1960_v7  ;;  %vm416_vm9 = vweird.f32 %v2080_v51  ;;  %872 = vmatpush.msra.mxu0 %v669_v20  ;;  %v472_v49 = vmul.f32 %v471_v22, %v2061_v42  ;;  %v769_v7 = vld [vmem:[#allocation7 + $0x3e8] sm:$0xff] }
  0xe3   :  { %v344_v1 = vsel %vm2114_vm5, %v343_v60, %v339_v53  ;;  %v379_v45 = vsel %vm2136_vm7, %v2075_v12, %v375_v44  ;;  %v703_v12 = vld [vmem:[#allocation7 + $0x1d8] sm:$0xff]  ;;  %v413_v21 = vsub.f32 1.0, %v412_v63  ;;  %v588_v60 = vmul.f32 %v2156_v16, %v2156_v16  ;;  %vm2179_vm10 = vmor %vm416_vm9, %vm417_vm8  ;;  %v733_v6 = vld [vmem:[#allocation7 + $0x2c8] sm:$0xff] }
  0xe4   :  { %v345_v13 = vmul.f32 %v344_v1, %v2070_v11  ;;  %v384_v14 = vsel %vm2118_vm6, %v383_v56, %v379_v45  ;;  %894 = vmatpush.msra.mxu1 %v703_v12  ;;  %v438_v44 = vmul.f32 %v437_v62, %v2015_v61  ;;  %v550_v2 = vmul.f32 2.1237322e-06, %v2158_v25  ;;  %915 = vmatpush.msra.mxu2 %v739_v30  ;;  %v697_v61 = vld [vmem:[#allocation7 + $0x1a8] sm:$0xff]  ;;  %v735_v53 = vld [vmem:[#allocation7 + $0x2d8] sm:$0xff] }
  0xe5   :  { %v385_v11 = vmul.f32 %v384_v14, %v2083_v55  ;;  %v414_v3 = vmul.f32 %v2127_v52, %v413_v21  ;;  %v771_v55 = vld [vmem:[#allocation7 + $0x3f8] sm:$0xff]  ;;  %v423_v50 = vor.u32 1.1754944e-38, %v422_v28  ;;  %v2183_v9 = vmin.f32 %v588_v60, 16.0  ;;  %873 = vmatpush.msra.mxu0 %v667_v34  ;;  %v765_v21 = vld [vmem:[#allocation7 + $0x3c8] sm:$0xff] }
  0xe6   :  { %v1625_v41 = vclamps-f32 %v345_v13, 1.0  ;;  %895 = vmatpush.msra.mxu1 %v701_v29  ;;  %938 = vmatpush.msra.mxu3 %v771_v55  ;;  %v400_v57 = vmul.f32 %v399_v27, %v1995_v31  ;;  %vm421_vm11 = vcmp.eq.f32.partialorder %v420_v32, 8.507059e+37  ;;  %v511_v51 = vadd.f32 0.00028619796, %v510_v33  ;;  %v663_v1 = vld [vmem:[#allocation7 + $0x98] sm:$0xff]  ;;  %v661_v22 = vld [vmem:[#allocation7 + $0x88] sm:$0xff] }
  0xe7   :  { %v415_v4 = vadd.f32 %v2127_v52, %v414_v3  ;;  %v1626_v56 = vclamps-f32 %v385_v11, 1.0  ;;  %916 = vmatpush.msra.mxu2 %v737_v40  ;;  %v2189_v45 = vpop.eup %1669  ;;  %v293_v63 = vmul.f32 0.5, %v1964_v8  ;;  %v590_v46 = vmul.f32 2.1237322e-06, %v2183_v9  ;;  %874 = vmatpush.msra.mxu0 %v665_v47  ;;  %v695_v31 = vld [vmem:[#allocation7 + $0x198] sm:$0xff]  ;;  %v693_v11 = vld [vmem:[#allocation7 + $0x188] sm:$0xff] }
  0xe8   :  { %v628_v54 = vadd.f32 1.0, %v1625_v41  ;;  %896 = vmatpush.msra.mxu1 %v699_v39  ;;  %939 = vmatpush.msra.mxu3 %v769_v7  ;;  %v452_v12 = vmul.f32 %v2189_v45, %v2153_v15  ;;  %v473_v18 = vadd.f32 0.0036580483, %v472_v49  ;;  %v460_v8 = vand.u32 2147483647, %v2153_v15  ;;  %v731_v27 = vld [vmem:[#allocation7 + $0x2b8] sm:$0xff] }
  0xe9   :  { %v419_v62 = vsel %vm2179_vm10, %v2127_v52, %v415_v4  ;;  %v629_v13 = vadd.f32 1.0, %v1626_v56  ;;  %v439_v52 = vadd.f32 1.1283791, %v438_v44  ;;  %917 = vmatpush.msra.mxu2 %v735_v53  ;;  %v551_v26 = vadd.f32 0.00028619796, %v550_v2  ;;  %875 = vmatpush.msra.mxu0 %v663_v1  ;;  %v763_v30 = vld [vmem:[#allocation7 + $0x3b8] sm:$0xff] }
  0xea   :  { %v424_v10 = vsel %vm421_vm11, %v423_v50, %v419_v62  ;;  %897 = vmatpush.msra.mxu1 %v697_v61  ;;  %940 = vmatpush.msra.mxu3 %v767_v0  ;;  %v2196_v28 = vmul.f32 %v628_v54, %v292_v38  ;;  %v294_v20 = vmul.f32 0.5, %v1984_v23  ;;  %v453_v29 = vsub.f32 1.0, %v452_v12  ;;  %v659_v34 = vld [vmem:[#allocation7 + $0x78] sm:$0xff]  ;;  %v729_v40 = vld [vmem:[#allocation7 + $0x2a8] sm:$0xff] }
  0xeb   :  { %v425_v14 = vmul.f32 %v424_v10, %v400_v57  ;;  %918 = vmatpush.msra.mxu2 %v733_v6  ;;  %v2199_v3 = vmul.f32 %v629_v13, %v293_v63  ;;  %v462_v32 = vand.u32 2147483648, %v2153_v15  ;;  %v512_v33 = vmul.f32 %v511_v51, %v2148_v5  ;;  %876 = vmatpush.msra.mxu0 %v661_v22  ;;  %v691_v23 = vld [vmem:[#allocation7 + $0x178] sm:$0xff]  ;;  %v657_v2 = vld [vmem:[#allocation7 + $0x68] sm:$0xff] }
  0xec   :  { %898 = vmatpush.msra.mxu1 %v695_v31  ;;  %v591_v55 = vadd.f32 0.00028619796, %v590_v46  ;;  %941 = vmatpush.msra.mxu3 %v765_v21  ;;  %v440_v38 = vmul.f32 %v439_v52, %v2000_v37  ;;  %v454_v39 = vmul.f32 %v2189_v45, %v453_v29  ;;  %vm457_vm12 = vweird.f32 %v2189_v45  ;;  %v761_v37 = vld [vmem:[#allocation7 + $0x3a8] sm:$0xff]  ;;  %v727_v50 = vld [vmem:[#allocation7 + $0x298] sm:$0xff] }
  0xed   :  { %v1627_v60 = vclamps-f32 %v425_v14, 1.0  ;;  %919 = vmatpush.msra.mxu2 %v731_v27  ;;  %v481_v41 = vmul.f32 3.8918573e-05, %v2061_v42  ;;  %vm2207_vm13 = vcmp.eq.f32.partialorder %v460_v8, 8.507059e+37  ;;  %v474_v44 = vmul.f32 %v473_v18, %v2061_v42  ;;  %793 = vmatmul.f32.vlgmr.msrb.gmra.mxu0 %v2196_v28  ;;  %v689_v48 = vld [vmem:[#allocation7 + $0x168] sm:$0xff]  ;;  %v655_v51 = vld [vmem:[#allocation7 + $0x58] sm:$0xff] }
  0xee   :  { %899 = vmatpush.msra.mxu1 %v693_v11  ;;  %v552_v49 = vmul.f32 %v551_v26, %v2158_v25  ;;  %942 = vmatpush.msra.mxu3 %v763_v30  ;;  %v455_v47 = vadd.f32 %v2189_v45, %v454_v39  ;;  %vm456_vm14 = vweird.f32 %v2153_v15  ;;  %v521_v53 = vmul.f32 3.8918573e-05, %v2148_v5  ;;  %v759_v15 = vld [vmem:[#allocation7 + $0x398] sm:$0xff]  ;;  %v725_v10 = vld [vmem:[#allocation7 + $0x288] sm:$0xff] }
  0xef   :  { %v630_v7 = vadd.f32 1.0, %v1627_v60  ;;  %816 = vmatmul.f32.vlgmr.msrb.gmra.mxu1 %v2199_v3  ;;  %877 = vmatpush.msra.mxu0 %v659_v34  ;;  %v482_v61 = vadd.f32 0.001143296, %v481_v41  ;;  %vm2220_vm15 = vmor %vm456_vm14, %vm457_vm12  ;;  %v463_v56 = vor.u32 1.1754944e-38, %v462_v32  ;;  %v513_v57 = vadd.f32 0.0036580483, %v512_v33 }
  0xf0   :  { %v592_v62 = vmul.f32 %v591_v55, %v2183_v9  ;;  %900 = vmatpush.msra.mxu1 %v691_v23  ;;  %920 = vmatpush.msra.mxu2 %v729_v40  ;;  %v459_v1 = vsel %vm2220_vm15, %v2189_v45, %v455_v47  ;;  %v687_v63 = vld [vmem:[#allocation7 + $0x158] sm:$0xff]  ;;  %v522_v31 = vadd.f32 0.001143296, %v521_v53  ;;  %v561_v6 = vmul.f32 3.8918573e-05, %v2158_v25  ;;  %v757_v12 = vld [vmem:[#allocation7 + $0x388] sm:$0xff] }
  0xf1   :  { %v2225_v0 = vmul.f32 %v630_v7, %v294_v20  ;;  %943 = vmatpush.msra.mxu3 %v761_v37  ;;  %878 = vmatpush.msra.mxu0 %v657_v2  ;;  %v483_v46 = vmul.f32 %v482_v61, %v2061_v42  ;;  %v464_v13 = vsel %vm2207_vm13, %v463_v56, %v459_v1  ;;  %v475_v14 = vadd.f32 0.05243302, %v474_v44  ;;  %v653_v45 = vld [vmem:[#allocation7 + $0x48] sm:$0xff]  ;;  %v723_v20 = vld [vmem:[#allocation7 + $0x278] sm:$0xff] }
  0xf2   :  { %v553_v52 = vadd.f32 0.0036580483, %v552_v49  ;;  %901 = vmatpush.msra.mxu1 %v689_v48  ;;  %921 = vmatpush.msra.mxu2 %v727_v50  ;;  %v465_v18 = vmul.f32 %v464_v13, %v440_v38  ;;  %v685_v21 = vld [vmem:[#allocation7 + $0x148] sm:$0xff]  ;;  %v523_v8 = vmul.f32 %v522_v31, %v2148_v5  ;;  %v562_v26 = vadd.f32 0.001143296, %v561_v6  ;;  %v755_v29 = vld [vmem:[#allocation7 + $0x378] sm:$0xff] }
  0xf3   :  { %944 = vmatpush.msra.mxu3 %v759_v15  ;;  %879 = vmatpush.msra.mxu0 %v655_v51  ;;  %v484_v22 = vadd.f32 0.014752088, %v483_v46  ;;  %v514_v11 = vmul.f32 %v513_v57, %v2148_v5  ;;  %v593_v27 = vadd.f32 0.0036580483, %v592_v62  ;;  %v601_v30 = vmul.f32 3.8918573e-05, %v2183_v9 }
  0xf4   :  { %902 = vmatpush.msra.mxu1 %v687_v63  ;;  %922 = vmatpush.msra.mxu2 %v725_v10  ;;  %v1628_v32 = vclamps-f32 %v465_v18, 1.0  ;;  %v524_v55 = vadd.f32 0.014752088, %v523_v8  ;;  %v563_v34 = vmul.f32 %v562_v26, %v2158_v25  ;;  %v295_v60 = vmul.f32 0.5, %v1988_v24  ;;  %v651_v10 = vld [vmem:[#allocation7 + $0x38] sm:$0xff]  ;;  %v721_v31 = vld [vmem:[#allocation7 + $0x268] sm:$0xff] }
  0xf5   :  { %945 = vmatpush.msra.mxu3 %v757_v12  ;;  %839 = vmatmul.f32.vlgmr.msrb.gmra.mxu2 %v2225_v0  ;;  %v485_v33 = vmul.f32 %v484_v22, %v2061_v42  ;;  %v476_v38 = vmul.f32 %v475_v14, %v2061_v42  ;;  %v602_v39 = vadd.f32 0.001143296, %v601_v30  ;;  %v515_v44 = vadd.f32 0.05243302, %v514_v11  ;;  %v683_v46 = vld [vmem:[#allocation7 + $0x138] sm:$0xff]  ;;  %v753_v13 = vld [vmem:[#allocation7 + $0x368] sm:$0xff] }
  0xf6   :  { %880 = vmatpush.msra.mxu0 %v653_v45  ;;  %903 = vmatpush.msra.mxu1 %v685_v21  ;;  %v631_v23 = vadd.f32 1.0, %v1628_v32  ;;  %v525_v41 = vmul.f32 %v524_v55, %v2148_v5  ;;  %v564_v4 = vadd.f32 0.014752088, %v563_v34  ;;  %v554_v49 = vmul.f32 %v553_v52, %v2158_v25  ;;  %v649_v14 = vld [vmem:[#allocation7 + $0x28] sm:$0xff]  ;;  %v719_v21 = vld [vmem:[#allocation7 + $0x258] sm:$0xff] }
  0xf7   :  { %923 = vmatpush.msra.mxu2 %v723_v20  ;;  %946 = vmatpush.msra.mxu3 %v755_v29  ;;  %v486_v40 = vadd.f32 0.112945676, %v485_v33  ;;  %v594_v37 = vmul.f32 %v593_v27, %v2183_v9  ;;  %v603_v2 = vmul.f32 %v602_v39, %v2183_v9  ;;  %v477_v61 = vadd.f32 0.18741608, %v476_v38  ;;  %v681_v52 = vld [vmem:[#allocation7 + $0x128] sm:$0xff]  ;;  %v751_v22 = vld [vmem:[#allocation7 + $0x358] sm:$0xff] }
  0xf8   :  { %v2246_v24 = vmul.f32 %v631_v23, %v295_v60  ;;  %v526_v47 = vadd.f32 0.112945676, %v525_v41  ;;  %v565_v48 = vmul.f32 %v564_v4, %v2158_v25  ;;  %v516_v57 = vmul.f32 %v515_v44, %v2148_v5  ;;  %881 = vmatpush.msra.mxu0 %v651_v10  ;;  %904 = vmatpush.msra.mxu1 %v683_v46  ;;  %v647_v8 = vld [vmem:[#allocation7 + $0x18] sm:$0xff]  ;;  %v717_v29 = vld [vmem:[#allocation7 + $0x248] sm:$0xff] }
  0xf9   :  { %v487_v7 = vmul.f32 %v486_v40, %v2061_v42  ;;  %v604_v50 = vadd.f32 0.014752088, %v603_v2  ;;  %v555_v62 = vadd.f32 0.05243302, %v554_v49  ;;  %v595_v15 = vadd.f32 0.05243302, %v594_v37  ;;  %924 = vmatpush.msra.mxu2 %v721_v31  ;;  %947 = vmatpush.msra.mxu3 %v753_v13 }
  0xfa   :  { %862 = vmatmul.f32.vlgmr.msrb.gmra.mxu3 %v2246_v24  ;;  %v527_v54 = vmul.f32 %v526_v47, %v2148_v5  ;;  %v566_v56 = vadd.f32 0.112945676, %v565_v48  ;;  %v517_v11 = vadd.f32 0.18741608, %v516_v57  ;;  %882 = vmatpush.msra.mxu0 %v649_v14  ;;  %v679_v20 = vld [vmem:[#allocation7 + $0x118] sm:$0xff]  ;;  %v749_v30 = vld [vmem:[#allocation7 + $0x348] sm:$0xff]  ;;  %v478_v38 = vmul.f32 %v477_v61, %v2061_v42 }
  0xfb   :  { %v488_v53 = vadd.f32 0.4994258, %v487_v7  ;;  %v605_v51 = vmul.f32 %v604_v50, %v2183_v9  ;;  %v556_v27 = vmul.f32 %v555_v62, %v2158_v25  ;;  %905 = vmatpush.msra.mxu1 %v681_v52  ;;  %v596_v33 = vmul.f32 %v595_v15, %v2183_v9  ;;  %925 = vmatpush.msra.mxu2 %v719_v21  ;;  %v645_v39 = vld [vmem:[#allocation7 + $0x8] sm:$0xff]  ;;  %v715_v40 = vld [vmem:[#allocation7 + $0x238] sm:$0xff] }
  0xfc   :  { %v528_v63 = vadd.f32 0.4994258, %v527_v54  ;;  %v567_v6 = vmul.f32 %v566_v56, %v2158_v25  ;;  %948 = vmatpush.msra.mxu3 %v751_v22  ;;  %883 = vmatpush.msra.mxu0 %v647_v8  ;;  %v677_v23 = vld [vmem:[#allocation7 + $0x108] sm:$0xff]  ;;  %v518_v41 = vmul.f32 %v517_v11, %v2148_v5  ;;  %v747_v44 = vld [vmem:[#allocation7 + $0x338] sm:$0xff]  ;;  %v479_v61 = vadd.f32 1.1283791, %v478_v38 }
  0xfd   :  { %v489_v1 = vmul.f32 %v488_v53, %v2061_v42  ;;  %v606_v12 = vadd.f32 0.112945676, %v605_v51  ;;  %906 = vmatpush.msra.mxu1 %v679_v20  ;;  %926 = vmatpush.msra.mxu2 %v717_v29  ;;  %v557_v4 = vadd.f32 0.18741608, %v556_v27  ;;  %v597_v49 = vadd.f32 0.18741608, %v596_v33 }
  0xfe   :  { %v529_v45 = vmul.f32 %v528_v63, %v2148_v5  ;;  %v568_v26 = vadd.f32 0.4994258, %v567_v6  ;;  %949 = vmatpush.msra.mxu3 %v749_v30  ;;  %884 = vmatpush.msra.mxu0 %v645_v39  ;;  %v713_v42 = vld [vmem:[#allocation7 + $0x228] sm:$0xff]  ;;  %v711_v47 = vld [vmem:[#allocation7 + $0x218] sm:$0xff]  ;;  %v519_v5 = vadd.f32 1.1283791, %v518_v41  ;;  %v480_v46 = vmul.f32 %v479_v61, %v2036_v58 }
  0xff   :  { %v2256_v18 = vadd.f32 1.0, %v489_v1  ;;  %v607_v32 = vmul.f32 %v606_v12, %v2183_v9  ;;  %907 = vmatpush.msra.mxu1 %v677_v23  ;;  %927 = vmatpush.msra.mxu2 %v715_v40  ;;  %v745_v7 = vld [vmem:[#allocation7 + $0x328] sm:$0xff]  ;;  %v743_v48 = vld [vmem:[#allocation7 + $0x318] sm:$0xff]  ;;  %v558_v62 = vmul.f32 %v557_v4, %v2158_v25  ;;  %v598_v15 = vmul.f32 %v597_v49, %v2183_v9 }
 0x100   :  { %v2263_v55 = vadd.f32 1.0, %v529_v45  ;;  %v569_v34 = vmul.f32 %v568_v26, %v2158_v25  ;;  %950 = vmatpush.msra.mxu3 %v747_v44  ;;  %v709_v56 = vld [vmem:[#allocation7 + $0x208] sm:$0xff]  ;;  %v296_v10 = vmul.f32 0.5, %v2020_v17  ;;  %v520_v25 = vmul.f32 %v519_v5, %v2088_v59 }
 0x101   :  { %1671 = vrcp.f32 %v2256_v18  ;;  %v608_v60 = vadd.f32 0.4994258, %v607_v32  ;;  %928 = vmatpush.msra.mxu2 %v713_v42  ;;  %v741_v57 = vld [vmem:[#allocation7 + $0x308] sm:$0xff]  ;;  %v500_v63 = vand.u32 2147483647, %v2256_v18  ;;  %v502_v31 = vand.u32 2147483648, %v2256_v18 }
 0x102   :  { %1673 = vrcp.f32 %v2263_v55  ;;  %v2269_v37 = vadd.f32 1.0, %v569_v34  ;;  %951 = vmatpush.msra.mxu3 %v745_v7  ;;  %v540_v13 = vand.u32 2147483647, %v2263_v55  ;;  %v559_v52 = vadd.f32 1.1283791, %v558_v62 }
 0x103   :  { %v609_v2 = vmul.f32 %v608_v60, %v2183_v9  ;;  %929 = vmatpush.msra.mxu2 %v711_v47  ;;  %v599_v12 = vadd.f32 1.1283791, %v598_v15  ;;  %v542_v17 = vand.u32 2147483648, %v2263_v55  ;;  %vm496_vm1 = vweird.f32 %v2256_v18 }
 0x104   :  { %1675 = vrcp.f32 %v2269_v37  ;;  %952 = vmatpush.msra.mxu3 %v743_v48  ;;  %vm501_vm2 = vcmp.eq.f32.partialorder %v500_v63, 8.507059e+37  ;;  %v503_v22 = vor.u32 1.1754944e-38, %v502_v31  ;;  %v582_v59 = vand.u32 2147483648, %v2269_v37 }
 0x105   :  { %v2274_v54 = vadd.f32 1.0, %v609_v2  ;;  %930 = vmatpush.msra.mxu2 %v709_v56  ;;  %vm536_vm5 = vweird.f32 %v2263_v55  ;;  %vm2291_vm6 = vcmp.eq.f32.partialorder %v540_v13, 8.507059e+37  ;;  %v543_v30 = vor.u32 1.1754944e-38, %v542_v17 }
 0x106   :  { %953 = vmatpush.msra.mxu3 %v741_v57  ;;  %v580_v60 = vand.u32 2147483647, %v2269_v37  ;;  %vm576_vm9 = vweird.f32 %v2269_v37  ;;  %v560_v42 = vmul.f32 %v559_v52, %v2096_v19  ;;  %v297_v61 = vmul.f32 0.5, %v2053_v35 }
 0x107   :  { %v1672_v50 = vpop.eup %1671  ;;  %1677 = vrcp.f32 %v2274_v54  ;;  %v622_v4 = vand.u32 2147483648, %v2274_v54  ;;  %v620_v2 = vand.u32 2147483647, %v2274_v54  ;;  %vm616_vm13 = vweird.f32 %v2274_v54 }
 0x108   :  { %v492_v53 = vmul.f32 %v1672_v50, %v2256_v18  ;;  %v1674_v51 = vpop.eup %1673  ;;  %vm497_vm0 = vweird.f32 %v1672_v50  ;;  %vm581_vm12 = vcmp.eq.f32.partialorder %v580_v60, 8.507059e+37  ;;  %v600_v57 = vmul.f32 %v599_v12, %v2156_v16  ;;  %v1152_v60 = vld [vmem:[%s2646_s5 + $0x78] sm:$0xff] }
 0x109   :  { %v532_v6 = vmul.f32 %v1674_v51, %v2263_v55  ;;  %vm498_vm3 = vmor %vm496_vm1, %vm497_vm0  ;;  %vm537_vm4 = vweird.f32 %v1674_v51  ;;  %v583_v55 = vor.u32 1.1754944e-38, %v582_v59  ;;  %v623_v56 = vor.u32 1.1754944e-38, %v622_v4  ;;  %1172 = vmatpush.msrb.mxu0 %v1152_v60  ;;  %v1149_v4 = vld [vmem:[%s2646_s5 + $0x60] sm:$0xff] }
 0x10a   :  { %v493_v1 = vsub.f32 1.0, %v492_v53  ;;  %v1676_v14 = vpop.eup %1675  ;;  %vm538_vm7 = vmor %vm536_vm5, %vm537_vm4  ;;  %vm621_vm15 = vcmp.eq.f32.partialorder %v620_v2, 8.507059e+37 }
 0x10b   :  { %v533_v45 = vsub.f32 1.0, %v532_v6  ;;  %v572_v58 = vmul.f32 %v1676_v14, %v2269_v37  ;;  %vm577_vm8 = vweird.f32 %v1676_v14 }
 0x10c   :  { %v494_v9 = vmul.f32 %v1672_v50, %v493_v1  ;;  %vm578_vm10 = vmor %vm576_vm9, %vm577_vm8 }
 0x10d   :  { %v534_v8 = vmul.f32 %v1674_v51, %v533_v45  ;;  %v1678_v26 = vpop.eup %1677  ;;  %v573_v20 = vsub.f32 1.0, %v572_v58 }
 0x10e   :  { %v495_v21 = vadd.f32 %v1672_v50, %v494_v9  ;;  %v612_v32 = vmul.f32 %v1678_v26, %v2274_v54  ;;  %vm617_vm11 = vweird.f32 %v1678_v26 }
 0x10f   :  { %v535_v18 = vadd.f32 %v1674_v51, %v534_v8  ;;  %v574_v34 = vmul.f32 %v1676_v14, %v573_v20  ;;  %vm618_vm14 = vmor %vm616_vm13, %vm617_vm11 }
 0x110   :  { %v499_v11 = vsel %vm498_vm3, %v1672_v50, %v495_v21  ;;  %v613_v39 = vsub.f32 1.0, %v612_v32 }
 0x111   :  { %v504_v29 = vsel %vm501_vm2, %v503_v22, %v499_v11  ;;  %v539_v38 = vsel %vm538_vm7, %v1674_v51, %v535_v18  ;;  %v575_v41 = vadd.f32 %v1676_v14, %v574_v34 }
 0x112   :  { %v505_v33 = vmul.f32 %v504_v29, %v480_v46  ;;  %v544_v40 = vsel %vm2291_vm6, %v543_v30, %v539_v38  ;;  %v614_v49 = vmul.f32 %v1678_v26, %v613_v39  ;;  %v298_v46 = vmul.f32 0.5, %v2057_v36  ;;  %v2312_v36 = vld [vmem:[#allocation8] sm:$0x3] }
 0x113   :  { %v545_v44 = vmul.f32 %v544_v40, %v520_v25  ;;  %v579_v47 = vsel %vm578_vm10, %v1676_v14, %v575_v41  ;;  %v1151_v39 = vld [vmem:[%s2646_s5 + $0x70] sm:$0xff] }
 0x114   :  { %v1629_v23 = vclamps-f32 %v505_v33, 1.0  ;;  %v584_v48 = vsel %vm581_vm12, %v583_v55, %v579_v47  ;;  %v615_v50 = vadd.f32 %v1678_v26, %v614_v49  ;;  %1173 = vmatpush.msrb.mxu0 %v1151_v39  ;;  %v1148_v49 = vld [vmem:[%s2646_s5 + $0x58] sm:$0xff]  ;;  %v1147_v47 = vld [vmem:[%s2646_s5 + $0x50] sm:$0xff] }
 0x115   :  { %v1630_v37 = vclamps-f32 %v545_v44, 1.0  ;;  %v585_v53 = vmul.f32 %v584_v48, %v560_v42  ;;  %v1163_v39 = vld [vmem:[%s2646_s5 + $0xd0] sm:$0xff] }
 0x116   :  { %v632_v7 = vadd.f32 1.0, %v1629_v23  ;;  %v619_v15 = vsel %vm618_vm14, %v1678_v26, %v615_v50  ;;  %v1150_v23 = vld [vmem:[%s2646_s5 + $0x68] sm:$0xff]  ;;  %v774_v50 = vperm.slane %v2312_v36, 1 }
 0x117   :  { %v633_v62 = vadd.f32 1.0, %v1630_v37  ;;  %v1631_v19 = vclamps-f32 %v585_v53, 1.0  ;;  %v624_v51 = vsel %vm621_vm15, %v623_v56, %v619_v15  ;;  %1174 = vmatpush.msrb.mxu0 %v1150_v23  ;;  %v1145_v15 = vld [vmem:[%s2646_s5 + $0x40] sm:$0xff] }
 0x118   :  { %v640_v5 = vmul.f32 %v632_v7, %v296_v10  ;;  %v625_v63 = vmul.f32 %v624_v51, %v600_v57  ;;  %v299_v10 = vmul.f32 0.5, %v2065_v43  ;;  %v773_v43 = vperm.slane %v2312_v36, 0  ;;  %v1143_v36 = vld [vmem:[%s2646_s5 + $0x30] sm:$0xff] }
 0x119   :  { %v641_v1 = vmul.f32 %v633_v62, %v297_v61  ;;  %v634_v31 = vadd.f32 1.0, %v1631_v19  ;;  %1175 = vmatpush.msrb.mxu0 %v1149_v4 }
 0x11a   :  { %796 = vmatmul.f32.gmra.mxu0 %v640_v5  ;;  %v1632_v54 = vclamps-f32 %v625_v63, 1.0 }
 0x11b   :  { %819 = vmatmul.f32.gmra.mxu1 %v641_v1  ;;  %v642_v35 = vmul.f32 %v634_v31, %v298_v46  ;;  %1176 = vmatpush.msrb.mxu0 %v1148_v49  ;;  %v1162_v49 = vld [vmem:[%s2646_s5 + $0xc8] sm:$0xff] }
 0x11c   :  { %v635_v6 = vadd.f32 1.0, %v1632_v54  ;;  %v1144_v54 = vld [vmem:[%s2646_s5 + $0x38] sm:$0xff] }
 0x11d   :  { %842 = vmatmul.f32.gmra.mxu2 %v642_v35  ;;  %1177 = vmatpush.msrb.mxu0 %v1147_v47  ;;  %v1137_v47 = vld [vmem:[%s2646_s5] sm:$0xff] }
 0x11e   :  { %v643_v25 = vmul.f32 %v635_v6, %v299_v10 }
 0x120   :  { %865 = vmatmul.f32.gmra.mxu3 %v643_v25 }
 0x122   :  { %885 = vmatmul.f32.vlgmr.msra.gmra.mxu0 %v2196_v28 }
 0x123   :  { %908 = vmatmul.f32.vlgmr.msra.gmra.mxu1 %v2199_v3 }
 0x125   :  { %931 = vmatmul.f32.vlgmr.msra.gmra.mxu2 %v2225_v0 }
 0x128   :  { %954 = vmatmul.f32.vlgmr.msra.gmra.mxu3 %v2246_v24 }
 0x12a   :  { %888 = vmatmul.f32.gmra.mxu0 %v640_v5  ;;  %v1146_v5 = vld [vmem:[%s2646_s5 + $0x48] sm:$0xff] }
 0x12b   :  { %911 = vmatmul.f32.gmra.mxu1 %v641_v1  ;;  %1178 = vmatpush.msrb.mxu0 %v1146_v5 }
 0x12d   :  { %934 = vmatmul.f32.gmra.mxu2 %v642_v35  ;;  %1179 = vmatpush.msrb.mxu0 %v1145_v15  ;;  %v1168_v35 = vld [vmem:[%s2646_s5 + $0xf8] sm:$0xff] }
 0x12e   :  { %1195 = vmatpush.msrb.mxu1 %v1168_v35 }
 0x12f   :  { %1180 = vmatpush.msrb.mxu0 %v1144_v54 }
 0x130   :  { %957 = vmatmul.f32.gmra.mxu3 %v643_v25 }
 0x131   :  { %1181 = vmatpush.msrb.mxu0 %v1143_v36 }
 0x16a   :  { %v794_v16 = vpop.f32.mrf.mxu0 }
 0x16b   :  { %v795_v9 = vadd.f32 %v794_v16, %v773_v43 }
 0x16c   :  { %v817_v13 = vpop.f32.mrf.mxu1 }
 0x16d   :  { %v818_v14 = vadd.f32 %v817_v13, %v795_v9 }
 0x178   :  { %v840_v28 = vpop.f32.mrf.mxu2 }
 0x179   :  { %v841_v52 = vadd.f32 %v840_v28, %v818_v14 }
 0x17d   :  { %v863_v12 = vpop.f32.mrf.mxu3 }
 0x17e   :  { %v2315_v3 = vadd.f32 %v863_v12, %v841_v52 }
 0x180   :  { %v2318_v0 = vmul.f32 0.70710677, %v2315_v3 }
 0x182   :  { %v969_v24 = vmul.f32 %v2318_v0, %v2318_v0 }
 0x184   :  { %v970_v45 = vmin.f32 %v969_v24, 16.0  ;;  %v1142_v24 = vld [vmem:[%s2646_s5 + $0x28] sm:$0xff] }
 0x185   :  { %1182 = vmatpush.msrb.mxu0 %v1142_v24 }
 0x186   :  { %v971_v17 = vmul.f32 2.1237322e-06, %v970_v45  ;;  %v982_v21 = vmul.f32 3.8918573e-05, %v970_v45 }
 0x188   :  { %v972_v58 = vadd.f32 0.00028619796, %v971_v17  ;;  %v983_v22 = vadd.f32 0.001143296, %v982_v21 }
 0x18a   :  { %v973_v8 = vmul.f32 %v972_v58, %v970_v45  ;;  %v984_v59 = vmul.f32 %v983_v22, %v970_v45  ;;  %v1141_v58 = vld [vmem:[%s2646_s5 + $0x20] sm:$0xff] }
 0x18b   :  { %v1165_v22 = vld [vmem:[%s2646_s5 + $0xe0] sm:$0xff]  ;;  %1183 = vmatpush.msrb.mxu0 %v1141_v58 }
 0x18c   :  { %v974_v26 = vadd.f32 0.0036580483, %v973_v8  ;;  %v985_v11 = vadd.f32 0.014752088, %v984_v59 }
 0x18e   :  { %v986_v27 = vmul.f32 %v985_v11, %v970_v45  ;;  %v975_v20 = vmul.f32 %v974_v26, %v970_v45 }
 0x190   :  { %v987_v29 = vadd.f32 0.112945676, %v986_v27  ;;  %v976_v30 = vadd.f32 0.05243302, %v975_v20  ;;  %v1140_v20 = vld [vmem:[%s2646_s5 + $0x18] sm:$0xff] }
 0x191   :  { %1184 = vmatpush.msrb.mxu0 %v1140_v20 }
 0x192   :  { %v988_v18 = vmul.f32 %v987_v29, %v970_v45  ;;  %v977_v38 = vmul.f32 %v976_v30, %v970_v45  ;;  %v1164_v29 = vld [vmem:[%s2646_s5 + $0xd8] sm:$0xff] }
 0x194   :  { %v989_v32 = vadd.f32 0.4994258, %v988_v18  ;;  %v978_v41 = vadd.f32 0.18741608, %v977_v38  ;;  %v1139_v38 = vld [vmem:[%s2646_s5 + $0x10] sm:$0xff] }
 0x195   :  { %1185 = vmatpush.msrb.mxu0 %v1139_v38 }
 0x196   :  { %v990_v34 = vmul.f32 %v989_v32, %v970_v45  ;;  %v979_v42 = vmul.f32 %v978_v41, %v970_v45  ;;  %v1166_v45 = vld [vmem:[%s2646_s5 + $0xe8] sm:$0xff]  ;;  %v961_v32 = vmul.f32 0.5, %v2315_v3 }
 0x197   :  { %v797_v33 = vpop.f32.mrf.mxu0 }
 0x198   :  { %v991_v55 = vadd.f32 1.0, %v990_v34  ;;  %v820_v40 = vpop.f32.mrf.mxu1  ;;  %v798_v44 = vadd.f32 %v797_v33, %v773_v43  ;;  %v980_v57 = vadd.f32 1.1283791, %v979_v42  ;;  %v1167_v43 = vld [vmem:[%s2646_s5 + $0xf0] sm:$0xff] }
 0x199   :  { %1196 = vmatpush.msrb.mxu1 %v1167_v43 }
 0x19a   :  { %1679 = vrcp.f32 %v991_v55  ;;  %v821_v37 = vadd.f32 %v820_v40, %v798_v44  ;;  %v1003_v62 = vand.u32 2147483648, %v991_v55  ;;  %v1001_v51 = vand.u32 2147483647, %v991_v55  ;;  %v1138_v44 = vld [vmem:[%s2646_s5 + $0x8] sm:$0xff] }
 0x19b   :  { %vm997_vm1 = vweird.f32 %v991_v55  ;;  %v981_v16 = vmul.f32 %v980_v57, %v2318_v0  ;;  %1197 = vmatpush.msrb.mxu1 %v1166_v45  ;;  %1186 = vmatpush.msrb.mxu0 %v1138_v44  ;;  %v1160_v57 = vld [vmem:[%s2646_s5 + $0xb8] sm:$0xff] }
 0x19c   :  { %v1004_v6 = vor.u32 1.1754944e-38, %v1003_v62  ;;  %vm1002_vm3 = vcmp.eq.f32.partialorder %v1001_v51, 8.507059e+37 }
 0x19d   :  { %1198 = vmatpush.msrb.mxu1 %v1165_v22  ;;  %1187 = vmatpush.msrb.mxu0 %v1137_v47 }
 0x19f   :  { %v886_v7 = vpop.f32.mrf.mxu0  ;;  %1199 = vmatpush.msrb.mxu1 %v1164_v29 }
 0x1a0   :  { %v1680_v2 = vpop.eup %1679  ;;  %v843_v61 = vpop.f32.mrf.mxu2  ;;  %v887_v1 = vadd.f32 %v886_v7, %v774_v50 }
 0x1a1   :  { %v993_v48 = vmul.f32 %v1680_v2, %v991_v55  ;;  %v844_v56 = vadd.f32 %v843_v61, %v821_v37  ;;  %vm998_vm0 = vweird.f32 %v1680_v2  ;;  %v909_v46 = vpop.f32.mrf.mxu1  ;;  %1200 = vmatpush.msrb.mxu1 %v1163_v39  ;;  %v1161_v37 = vld [vmem:[%s2646_s5 + $0xc0] sm:$0xff] }
 0x1a2   :  { %vm999_vm2 = vmor %vm997_vm1, %vm998_vm0  ;;  %v910_v13 = vadd.f32 %v909_v46, %v887_v1  ;;  %v1159_v1 = vld [vmem:[%s2646_s5 + $0xb0] sm:$0xff] }
 0x1a3   :  { %v994_v53 = vsub.f32 1.0, %v993_v48  ;;  %v866_v63 = vpop.f32.mrf.mxu3  ;;  %1201 = vmatpush.msrb.mxu1 %v1162_v49 }
 0x1a4   :  { %v2347_v31 = vadd.f32 %v866_v63, %v844_v56 }
 0x1a5   :  { %v995_v19 = vmul.f32 %v1680_v2, %v994_v53  ;;  %1202 = vmatpush.msrb.mxu1 %v1161_v37 }
 0x1a6   :  { %v2356_v25 = vmul.f32 0.70710677, %v2347_v31 }
 0x1a7   :  { %v996_v10 = vadd.f32 %v1680_v2, %v995_v19  ;;  %v889_v52 = vpop.f32.mrf.mxu0  ;;  %1203 = vmatpush.msrb.mxu1 %v1160_v57 }
 0x1a8   :  { %v1049_v28 = vmul.f32 %v2356_v25, %v2356_v25  ;;  %v932_v12 = vpop.f32.mrf.mxu2  ;;  %v890_v59 = vadd.f32 %v889_v52, %v774_v50 }
 0x1a9   :  { %v1000_v9 = vsel %vm999_vm2, %v1680_v2, %v996_v10  ;;  %v933_v17 = vadd.f32 %v932_v12, %v910_v13  ;;  %v912_v34 = vpop.f32.mrf.mxu1  ;;  %1204 = vmatpush.msrb.mxu1 %v1159_v1  ;;  %v1158_v10 = vld [vmem:[%s2646_s5 + $0xa8] sm:$0xff]  ;;  %v1157_v13 = vld [vmem:[%s2646_s5 + $0xa0] sm:$0xff]  ;;  %v1156_v12 = vld [vmem:[%s2646_s5 + $0x98] sm:$0xff] }
 0x1aa   :  { %v1005_v14 = vsel %vm1002_vm3, %v1004_v6, %v1000_v9  ;;  %v2373_v21 = vmin.f32 %v1049_v28, 16.0  ;;  %v913_v55 = vadd.f32 %v912_v34, %v890_v59  ;;  %v1155_v59 = vld [vmem:[%s2646_s5 + $0x90] sm:$0xff] }
 0x1ab   :  { %v1006_v0 = vmul.f32 %v1005_v14, %v981_v16  ;;  %v955_v26 = vpop.f32.mrf.mxu3  ;;  %1205 = vmatpush.msrb.mxu1 %v1158_v10 }
 0x1ac   :  { %v1051_v11 = vmul.f32 2.1237322e-06, %v2373_v21  ;;  %v2382_v27 = vadd.f32 %v955_v26, %v933_v17  ;;  %v1062_v18 = vmul.f32 3.8918573e-05, %v2373_v21  ;;  %v1154_v26 = vld [vmem:[%s2646_s5 + $0x88] sm:$0xff] }
 0x1ad   :  { %v1633_v8 = vclamps-f32 %v1006_v0, 1.0  ;;  %1206 = vmatpush.msrb.mxu1 %v1157_v13 }
 0x1ae   :  { %v1052_v33 = vadd.f32 0.00028619796, %v1051_v11  ;;  %v2393_v60 = vmul.f32 0.70710677, %v2382_v27  ;;  %v1063_v23 = vadd.f32 0.001143296, %v1062_v18 }
 0x1af   :  { %v1129_v30 = vadd.f32 1.0, %v1633_v8  ;;  %1207 = vmatpush.msrb.mxu1 %v1156_v12  ;;  %v963_v12 = vmul.f32 0.5, %v2347_v31 }
 0x1b0   :  { %v1053_v41 = vmul.f32 %v1052_v33, %v2373_v21  ;;  %v1009_v3 = vmul.f32 %v2393_v60, %v2393_v60  ;;  %v935_v4 = vpop.f32.mrf.mxu2  ;;  %v1064_v42 = vmul.f32 %v1063_v23, %v2373_v21 }
 0x1b1   :  { %v1133_v40 = vmul.f32 %v1129_v30, %v961_v32  ;;  %v936_v2 = vadd.f32 %v935_v4, %v913_v55  ;;  %1208 = vmatpush.msrb.mxu1 %v1155_v59  ;;  %v1153_v30 = vld [vmem:[%s2646_s5 + $0x80] sm:$0xff] }
 0x1b2   :  { %v2411_v7 = vmin.f32 %v1009_v3, 16.0  ;;  %v1054_v48 = vadd.f32 0.0036580483, %v1053_v41  ;;  %v1065_v61 = vadd.f32 0.014752088, %v1064_v42 }
 0x1b3   :  { %v958_v50 = vpop.f32.mrf.mxu3  ;;  %1188 = vmatmul.f32.vlgmr.msrb.gmra.mxu0 %v1133_v40  ;;  %1209 = vmatpush.msrb.mxu1 %v1154_v26 }
 0x1b4   :  { %v1011_v5 = vmul.f32 2.1237322e-06, %v2411_v7  ;;  %v1022_v53 = vmul.f32 3.8918573e-05, %v2411_v7  ;;  %v2421_v56 = vadd.f32 %v958_v50, %v936_v2  ;;  %v1066_v62 = vmul.f32 %v1065_v61, %v2373_v21 }
 0x1b5   :  { %v1055_v46 = vmul.f32 %v1054_v48, %v2373_v21  ;;  %1210 = vmatpush.msrb.mxu1 %v1153_v30 }
 0x1b6   :  { %v1012_v15 = vadd.f32 0.00028619796, %v1011_v5  ;;  %v1023_v19 = vadd.f32 0.001143296, %v1022_v53  ;;  %v2428_v51 = vmul.f32 0.70710677, %v2421_v56 }
 0x1b7   :  { %v1067_v63 = vadd.f32 0.112945676, %v1066_v62  ;;  %v1056_v28 = vadd.f32 0.05243302, %v1055_v46 }
 0x1b8   :  { %v1013_v54 = vmul.f32 %v1012_v15, %v2411_v7  ;;  %v1024_v35 = vmul.f32 %v1023_v19, %v2411_v7  ;;  %v1089_v6 = vmul.f32 %v2428_v51, %v2428_v51 }
 0x1b9   :  { %v1068_v36 = vmul.f32 %v1067_v63, %v2373_v21  ;;  %v1057_v11 = vmul.f32 %v1056_v28, %v2373_v21 }
 0x1ba   :  { %v1014_v43 = vadd.f32 0.0036580483, %v1013_v54  ;;  %v1025_v16 = vadd.f32 0.014752088, %v1024_v35  ;;  %v2442_v9 = vmin.f32 %v1089_v6, 16.0 }
 0x1bb   :  { %v1069_v14 = vadd.f32 0.4994258, %v1068_v36  ;;  %v1058_v38 = vadd.f32 0.18741608, %v1057_v11 }
 0x1bc   :  { %v1026_v52 = vmul.f32 %v1025_v16, %v2411_v7  ;;  %v1015_v24 = vmul.f32 %v1014_v43, %v2411_v7  ;;  %v1091_v45 = vmul.f32 2.1237322e-06, %v2442_v9  ;;  %v1102_v17 = vmul.f32 3.8918573e-05, %v2442_v9 }
 0x1bd   :  { %v1070_v0 = vmul.f32 %v1069_v14, %v2373_v21  ;;  %v1059_v44 = vmul.f32 %v1058_v38, %v2373_v21 }
 0x1be   :  { %v1027_v58 = vadd.f32 0.112945676, %v1026_v52  ;;  %v1092_v22 = vadd.f32 0.00028619796, %v1091_v45  ;;  %v1103_v29 = vadd.f32 0.001143296, %v1102_v17 }
 0x1bf   :  { %v1071_v8 = vadd.f32 1.0, %v1070_v0  ;;  %v1016_v18 = vadd.f32 0.05243302, %v1015_v24  ;;  %v1060_v48 = vadd.f32 1.1283791, %v1059_v44 }
 0x1c0   :  { %v1028_v20 = vmul.f32 %v1027_v58, %v2411_v7  ;;  %v1093_v33 = vmul.f32 %v1092_v22, %v2442_v9  ;;  %v1104_v34 = vmul.f32 %v1103_v29, %v2442_v9 }
 0x1c1   :  { %1681 = vrcp.f32 %v1071_v8  ;;  %v1017_v23 = vmul.f32 %v1016_v18, %v2411_v7  ;;  %v1083_v50 = vand.u32 2147483648, %v1071_v8  ;;  %v1081_v57 = vand.u32 2147483647, %v1071_v8 }
 0x1c2   :  { %v1029_v32 = vadd.f32 0.4994258, %v1028_v20  ;;  %v1105_v39 = vadd.f32 0.014752088, %v1104_v34  ;;  %v1094_v41 = vadd.f32 0.0036580483, %v1093_v33  ;;  %vm1077_vm5 = vweird.f32 %v1071_v8 }
 0x1c3   :  { %v1018_v49 = vadd.f32 0.18741608, %v1017_v23  ;;  %v1061_v63 = vmul.f32 %v1060_v48, %v2356_v25  ;;  %v1084_v46 = vor.u32 1.1754944e-38, %v1083_v50  ;;  %vm1082_vm7 = vcmp.eq.f32.partialorder %v1081_v57, 8.507059e+37  ;;  %v1318_v50 = vld [vmem:[%s2648_s7 + $0x60] sm:$0xff]  ;;  %v1316_v57 = vld [vmem:[%s2648_s7 + $0x50] sm:$0xff] }
 0x1c4   :  { %v1030_v55 = vmul.f32 %v1029_v32, %v2411_v7  ;;  %v1106_v3 = vmul.f32 %v1105_v39, %v2442_v9  ;;  %v1095_v42 = vmul.f32 %v1094_v41, %v2442_v9  ;;  %v962_v18 = vmul.f32 0.5, %v2382_v27 }
 0x1c5   :  { %v1019_v5 = vmul.f32 %v1018_v49, %v2411_v7  ;;  %v1659_v49 = vld [vmem:[#allocation10] ss:$0 sm:$0xff] }
 0x1c6   :  { %v1031_v40 = vadd.f32 1.0, %v1030_v55  ;;  %v1107_v47 = vadd.f32 0.112945676, %v1106_v3  ;;  %v1096_v15 = vadd.f32 0.05243302, %v1095_v42  ;;  %v964_v3 = vmul.f32 0.5, %v2421_v56 }
 0x1c7   :  { %v1682_v4 = vpop.eup %1681  ;;  %v1020_v35 = vadd.f32 1.1283791, %v1019_v5  ;;  %v1319_v56 = vld [vmem:[%s2648_s7 + $0x68] sm:$0xff]  ;;  %v1317_v5 = vld [vmem:[%s2648_s7 + $0x58] sm:$0xff] }
 0x1c8   :  { %1683 = vrcp.f32 %v1031_v40  ;;  %v1073_v2 = vmul.f32 %v1682_v4, %v1071_v8  ;;  %v1108_v61 = vmul.f32 %v1107_v47, %v2442_v9  ;;  %vm1078_vm4 = vweird.f32 %v1682_v4 }
 0x1c9   :  { %vm1079_vm6 = vmor %vm1077_vm5, %vm1078_vm4  ;;  %v1043_v7 = vand.u32 2147483648, %v1031_v40  ;;  %v1097_v36 = vmul.f32 %v1096_v15, %v2442_v9  ;;  %v1041_v14 = vand.u32 2147483647, %v1031_v40  ;;  %vm1037_vm9 = vweird.f32 %v1031_v40  ;;  %v1315_v15 = vld [vmem:[%s2648_s7 + $0x48] sm:$0xff] }
 0x1ca   :  { %v1074_v37 = vsub.f32 1.0, %v1073_v2  ;;  %v1109_v19 = vadd.f32 0.4994258, %v1108_v61  ;;  %v1021_v0 = vmul.f32 %v1020_v35, %v2393_v60  ;;  %v1321_v2 = vld [vmem:[%s2648_s7 + $0x78] sm:$0xff] }
 0x1cb   :  { %v1044_v24 = vor.u32 1.1754944e-38, %v1043_v7  ;;  %v1098_v45 = vadd.f32 0.18741608, %v1097_v36  ;;  %vm1042_vm11 = vcmp.eq.f32.partialorder %v1041_v14, 8.507059e+37  ;;  %1325 = vmatpush.msrb.mxu2 %v1321_v2 }
 0x1cc   :  { %v1075_v53 = vmul.f32 %v1682_v4, %v1074_v37  ;;  %v1110_v54 = vmul.f32 %v1109_v19, %v2442_v9 }
 0x1cd   :  { %v1099_v11 = vmul.f32 %v1098_v45, %v2442_v9 }
 0x1ce   :  { %v1684_v62 = vpop.eup %1683  ;;  %v1076_v1 = vadd.f32 %v1682_v4, %v1075_v53  ;;  %v1111_v16 = vadd.f32 1.0, %v1110_v54 }
 0x1cf   :  { %v1033_v21 = vmul.f32 %v1684_v62, %v1031_v40  ;;  %vm1038_vm8 = vweird.f32 %v1684_v62  ;;  %v1100_v32 = vadd.f32 1.1283791, %v1099_v11 }
 0x1d0   :  { %v1080_v6 = vsel %vm1079_vm6, %v1682_v4, %v1076_v1  ;;  %1685 = vrcp.f32 %v1111_v16  ;;  %vm1039_vm10 = vmor %vm1037_vm9, %vm1038_vm8  ;;  %v1123_v33 = vand.u32 2147483648, %v1111_v16  ;;  %v1121_v38 = vand.u32 2147483647, %v1111_v16 }
 0x1d1   :  { %v1034_v10 = vsub.f32 1.0, %v1033_v21  ;;  %v1085_v43 = vsel %vm1082_vm7, %v1084_v46, %v1080_v6  ;;  %vm1117_vm13 = vweird.f32 %v1111_v16  ;;  %v1101_v9 = vmul.f32 %v1100_v32, %v2428_v51  ;;  %v1320_v51 = vld [vmem:[%s2648_s7 + $0x70] sm:$0xff] }
 0x1d2   :  { %v1086_v28 = vmul.f32 %v1085_v43, %v1061_v63  ;;  %v1124_v39 = vor.u32 1.1754944e-38, %v1123_v33  ;;  %vm1122_vm15 = vcmp.eq.f32.partialorder %v1121_v38, 8.507059e+37  ;;  %1326 = vmatpush.msrb.mxu2 %v1320_v51  ;;  %v1314_v63 = vld [vmem:[%s2648_s7 + $0x40] sm:$0xff] }
 0x1d3   :  { %v1035_v13 = vmul.f32 %v1684_v62, %v1034_v10  ;;  %v1313_v10 = vld [vmem:[%s2648_s7 + $0x38] sm:$0xff] }
 0x1d4   :  { %v1635_v25 = vclamps-f32 %v1086_v28, 1.0  ;;  %1327 = vmatpush.msrb.mxu2 %v1319_v56  ;;  %v1311_v28 = vld [vmem:[%s2648_s7 + $0x28] sm:$0xff] }
 0x1d5   :  { %v1036_v52 = vadd.f32 %v1684_v62, %v1035_v13 }
 0x1d6   :  { %v1131_v58 = vadd.f32 1.0, %v1635_v25  ;;  %v1686_v26 = vpop.eup %1685  ;;  %1328 = vmatpush.msrb.mxu2 %v1318_v50 }
 0x1d7   :  { %v1040_v17 = vsel %vm1039_vm10, %v1684_v62, %v1036_v52  ;;  %v1113_v29 = vmul.f32 %v1686_v26, %v1111_v16  ;;  %vm1118_vm12 = vweird.f32 %v1686_v26  ;;  %v1312_v16 = vld [vmem:[%s2648_s7 + $0x30] sm:$0xff] }
 0x1d8   :  { %v1045_v22 = vsel %vm1042_vm11, %v1044_v24, %v1040_v17  ;;  %v1135_v59 = vmul.f32 %v1131_v58, %v963_v12  ;;  %vm1119_vm14 = vmor %vm1117_vm13, %vm1118_vm12  ;;  %1329 = vmatpush.msrb.mxu2 %v1317_v5  ;;  %v1310_v12 = vld [vmem:[%s2648_s7 + $0x20] sm:$0xff]  ;;  %v1309_v17 = vld [vmem:[%s2648_s7 + $0x18] sm:$0xff]  ;;  %vm1447_vm12 = vcmask 523264  }
 0x1d9   :  { %v1046_v8 = vmul.f32 %v1045_v22, %v1021_v0  ;;  %v1114_v30 = vsub.f32 1.0, %v1113_v29  ;;  %v1308_v22 = vld [vmem:[%s2648_s7 + $0x10] sm:$0xff] }
 0x1da   :  { %1191 = vmatmul.f32.gmra.mxu0 %v1135_v59  ;;  %1330 = vmatpush.msrb.mxu2 %v1316_v57  ;;  %v1307_v59 = vld [vmem:[%s2648_s7 + $0x8] sm:$0xff] }
 0x1db   :  { %v1634_v20 = vclamps-f32 %v1046_v8, 1.0  ;;  %v1115_v60 = vmul.f32 %v1686_v26, %v1114_v30 }
 0x1dc   :  { %1331 = vmatpush.msrb.mxu2 %v1315_v15 }
 0x1dd   :  { %v1130_v31 = vadd.f32 1.0, %v1634_v20  ;;  %v1116_v55 = vadd.f32 %v1686_v26, %v1115_v60 }
 0x1de   :  { %1332 = vmatpush.msrb.mxu2 %v1314_v63 }
 0x1df   :  { %v1134_v34 = vmul.f32 %v1130_v31, %v962_v18  ;;  %v1120_v23 = vsel %vm1119_vm14, %v1686_v26, %v1116_v55  ;;  %v1306_v18 = vld [vmem:[%s2648_s7] sm:$0xff] }
 0x1e0   :  { %v1125_v40 = vsel %vm1122_vm15, %v1124_v39, %v1120_v23  ;;  %1333 = vmatpush.msrb.mxu2 %v1313_v10 }
 0x1e1   :  { %1211 = vmatmul.f32.vlgmr.msrb.gmra.mxu1 %v1134_v34  ;;  %v1126_v41 = vmul.f32 %v1125_v40, %v1101_v9 }
 0x1e2   :  { %1334 = vmatpush.msrb.mxu2 %v1312_v16 }
 0x1e3   :  { %v1636_v27 = vclamps-f32 %v1126_v41, 1.0 }
 0x1e4   :  { %1335 = vmatpush.msrb.mxu2 %v1311_v28 }
 0x1e5   :  { %v1132_v4 = vadd.f32 1.0, %v1636_v27 }
 0x1e6   :  { %1336 = vmatpush.msrb.mxu2 %v1310_v12 }
 0x1e7   :  { %v1136_v44 = vmul.f32 %v1132_v4, %v964_v3 }
 0x1e8   :  { %1337 = vmatpush.msrb.mxu2 %v1309_v17 }
 0x1e9   :  { %1214 = vmatmul.f32.gmra.mxu1 %v1136_v44 }
 0x1ea   :  { %1338 = vmatpush.msrb.mxu2 %v1308_v22 }
 0x1ec   :  { %1339 = vmatpush.msrb.mxu2 %v1307_v59  ;;  %v1660_v59 = vld [vmem:[%s2649_s8] ss:$0 sm:$0xff]  ;;  %s1608_s8 = sshll.u32 %s1862_s0, 4  ;;  %s1609_s8 = int_to_ptr.vmem [resolvable:$true] %s1608_s8 }
 0x1ee   :  { %1340 = vmatpush.msrb.mxu2 %v1306_v18 }
 0x230   :  { %v1189_v42 = vpop.f32.mrf.mxu0 }
 0x231   :  { %v1190_v47 = vadd.f32 %v1659_v49, %v1189_v42 }
 0x257   :  { %v1192_v19 = vpop.f32.mrf.mxu0 }
 0x258   :  { %v1193_v46 = vadd.f32 %v1659_v49, %v1192_v19 }
 0x25e   :  { %v1212_v37 = vpop.f32.mrf.mxu1 }
 0x25f   :  { %v2493_v48 = vadd.f32 %v1212_v37, %v1190_v47 }
 0x261   :  { %v2499_v61 = vmul.f32 0.70710677, %v2493_v48 }
 0x263   :  { %v1222_v53 = vmul.f32 %v2499_v61, %v2499_v61 }
 0x265   :  { %v1223_v62 = vmin.f32 %v1222_v53, 16.0 }
 0x266   :  { %v1215_v6 = vpop.f32.mrf.mxu1 }
 0x267   :  { %v1224_v21 = vmul.f32 2.1237322e-06, %v1223_v62  ;;  %v1235_v1 = vmul.f32 3.8918573e-05, %v1223_v62  ;;  %v2518_v43 = vadd.f32 %v1215_v6, %v1193_v46  ;;  %v1218_v6 = vmul.f32 0.5, %v2493_v48 }
 0x269   :  { %v1225_v54 = vadd.f32 0.00028619796, %v1224_v21  ;;  %v1236_v35 = vadd.f32 0.001143296, %v1235_v1  ;;  %v2527_v52 = vmul.f32 0.70710677, %v2518_v43 }
 0x26b   :  { %v1226_v7 = vmul.f32 %v1225_v54, %v1223_v62  ;;  %v1237_v36 = vmul.f32 %v1236_v35, %v1223_v62  ;;  %v1262_v24 = vmul.f32 %v2527_v52, %v2527_v52 }
 0x26d   :  { %v1227_v13 = vadd.f32 0.0036580483, %v1226_v7  ;;  %v1238_v14 = vadd.f32 0.014752088, %v1237_v36  ;;  %v1263_v58 = vmin.f32 %v1262_v24, 16.0 }
 0x26f   :  { %v1239_v25 = vmul.f32 %v1238_v14, %v1223_v62  ;;  %v1228_v45 = vmul.f32 %v1227_v13, %v1223_v62  ;;  %v1264_v26 = vmul.f32 2.1237322e-06, %v1263_v58  ;;  %v1275_v11 = vmul.f32 3.8918573e-05, %v1263_v58 }
 0x271   :  { %v1240_v0 = vadd.f32 0.112945676, %v1239_v25  ;;  %v1229_v20 = vadd.f32 0.05243302, %v1228_v45  ;;  %v1265_v31 = vadd.f32 0.00028619796, %v1264_v26 }
 0x272   :  { %v1276_v30 = vadd.f32 0.001143296, %v1275_v11 }
 0x273   :  { %v1241_v8 = vmul.f32 %v1240_v0, %v1223_v62  ;;  %v1266_v33 = vmul.f32 %v1265_v31, %v1263_v58  ;;  %v1230_v60 = vmul.f32 %v1229_v20, %v1223_v62 }
 0x274   :  { %v1277_v34 = vmul.f32 %v1276_v30, %v1263_v58 }
 0x275   :  { %v1242_v29 = vadd.f32 0.4994258, %v1241_v8  ;;  %v1267_v39 = vadd.f32 0.0036580483, %v1266_v33  ;;  %v1231_v23 = vadd.f32 0.18741608, %v1230_v60 }
 0x276   :  { %v1278_v55 = vadd.f32 0.014752088, %v1277_v34 }
 0x277   :  { %v1243_v32 = vmul.f32 %v1242_v29, %v1223_v62  ;;  %v1268_v41 = vmul.f32 %v1267_v39, %v1263_v58  ;;  %v1232_v4 = vmul.f32 %v1231_v23, %v1223_v62 }
 0x278   :  { %v1279_v9 = vmul.f32 %v1278_v55, %v1263_v58  ;;  %v1442_v55 = vld [vmem:[%s2650_s9 + $0x30] sm:$0xff] }
 0x279   :  { %v1244_v38 = vadd.f32 1.0, %v1243_v32  ;;  %v1269_v2 = vadd.f32 0.05243302, %v1268_v41  ;;  %v1233_v47 = vadd.f32 1.1283791, %v1232_v4  ;;  %v1443_v32 = vld [vmem:[%s2650_s9 + $0x38] sm:$0xff] }
 0x27a   :  { %v1280_v40 = vadd.f32 0.112945676, %v1279_v9  ;;  %1462 = vmatpush.msrb.mxu3 %v1443_v32 }
 0x27b   :  { %1687 = vrcp.f32 %v1244_v38  ;;  %v1256_v56 = vand.u32 2147483648, %v1244_v38  ;;  %v1254_v50 = vand.u32 2147483647, %v1244_v38  ;;  %v1270_v53 = vmul.f32 %v1269_v2, %v1263_v58  ;;  %v1439_v2 = vld [vmem:[%s2650_s9 + $0x18] sm:$0xff] }
 0x27c   :  { %v1281_v27 = vmul.f32 %v1280_v40, %v1263_v58  ;;  %vm1250_vm1 = vweird.f32 %v1244_v38  ;;  %v1234_v19 = vmul.f32 %v1233_v47, %v2499_v61  ;;  %1463 = vmatpush.msrb.mxu3 %v1442_v55  ;;  %v1441_v40 = vld [vmem:[%s2650_s9 + $0x28] sm:$0xff] }
 0x27d   :  { %v1257_v15 = vor.u32 1.1754944e-38, %v1256_v56  ;;  %vm1255_vm3 = vcmp.eq.f32.partialorder %v1254_v50, 8.507059e+37  ;;  %v1271_v1 = vadd.f32 0.18741608, %v1270_v53  ;;  %v1438_v56 = vld [vmem:[%s2650_s9 + $0x10] sm:$0xff] }
 0x27e   :  { %v1282_v49 = vadd.f32 0.4994258, %v1281_v27  ;;  %1464 = vmatpush.msrb.mxu3 %v1441_v40 }
 0x27f   :  { %v1272_v35 = vmul.f32 %v1271_v1, %v1263_v58 }
 0x280   :  { %v1283_v51 = vmul.f32 %v1282_v49, %v1263_v58  ;;  %v1219_v58 = vmul.f32 0.5, %v2518_v43 }
 0x281   :  { %v1688_v3 = vpop.eup %1687  ;;  %v1273_v14 = vadd.f32 1.1283791, %v1272_v35 }
 0x282   :  { %v1246_v44 = vmul.f32 %v1688_v3, %v1244_v38  ;;  %vm1251_vm0 = vweird.f32 %v1688_v3  ;;  %v1284_v5 = vadd.f32 1.0, %v1283_v51 }
 0x283   :  { %vm1252_vm2 = vmor %vm1250_vm1, %vm1251_vm0  ;;  %v1274_v24 = vmul.f32 %v1273_v14, %v2527_v52 }
 0x284   :  { %v1247_v42 = vsub.f32 1.0, %v1246_v44  ;;  %1689 = vrcp.f32 %v1284_v5  ;;  %v1296_v13 = vand.u32 2147483648, %v1284_v5  ;;  %v1294_v25 = vand.u32 2147483647, %v1284_v5 }
 0x285   :  { %vm1290_vm5 = vweird.f32 %v1284_v5 }
 0x286   :  { %v1248_v37 = vmul.f32 %v1688_v3, %v1247_v42  ;;  %v1297_v12 = vor.u32 1.1754944e-38, %v1296_v13  ;;  %vm1295_vm7 = vcmp.eq.f32.partialorder %v1294_v25, 8.507059e+37 }
 0x288   :  { %v1249_v57 = vadd.f32 %v1688_v3, %v1248_v37 }
 0x28a   :  { %v1253_v62 = vsel %vm1252_vm2, %v1688_v3, %v1249_v57  ;;  %v1690_v46 = vpop.eup %1689  ;;  %v1440_v3 = vld [vmem:[%s2650_s9 + $0x20] sm:$0xff]  ;;  %v1437_v57 = vld [vmem:[%s2650_s9 + $0x8] sm:$0xff] }
 0x28b   :  { %v1258_v21 = vsel %vm1255_vm3, %v1257_v15, %v1253_v62  ;;  %v1286_v10 = vmul.f32 %v1690_v46, %v1284_v5  ;;  %vm1291_vm4 = vweird.f32 %v1690_v46  ;;  %1465 = vmatpush.msrb.mxu3 %v1440_v3 }
 0x28c   :  { %v1259_v63 = vmul.f32 %v1258_v21, %v1234_v19  ;;  %vm1292_vm6 = vmor %vm1290_vm5, %vm1291_vm4  ;;  %v1436_v21 = vld [vmem:[%s2650_s9] sm:$0xff]  ;;  %vm1572_vm5 = vcmask 261120  }
 0x28d   :  { %v1287_v36 = vsub.f32 1.0, %v1286_v10  ;;  %1466 = vmatpush.msrb.mxu3 %v1439_v2 }
 0x28e   :  { %v1637_v54 = vclamps-f32 %v1259_v63, 1.0 }
 0x28f   :  { %v1288_v28 = vmul.f32 %v1690_v46, %v1287_v36  ;;  %1467 = vmatpush.msrb.mxu3 %v1438_v56 }
 0x290   :  { %v1302_v7 = vadd.f32 1.0, %v1637_v54 }
 0x291   :  { %v1289_v61 = vadd.f32 %v1690_v46, %v1288_v28  ;;  %1468 = vmatpush.msrb.mxu3 %v1437_v57 }
 0x292   :  { %v1304_v16 = vmul.f32 %v1302_v7, %v1218_v6 }
 0x293   :  { %v1293_v45 = vsel %vm1292_vm6, %v1690_v46, %v1289_v61  ;;  %1469 = vmatpush.msrb.mxu3 %v1436_v21 }
 0x294   :  { %1341 = vmatmul.f32.vlgmr.msrb.gmra.mxu2 %v1304_v16  ;;  %v1298_v0 = vsel %vm1295_vm7, %v1297_v12, %v1293_v45 }
 0x295   :  { %v1299_v17 = vmul.f32 %v1298_v0, %v1274_v24 }
 0x297   :  { %v1638_v48 = vclamps-f32 %v1299_v17, 1.0 }
 0x299   :  { %v1303_v22 = vadd.f32 1.0, %v1638_v48 }
 0x29b   :  { %v1305_v8 = vmul.f32 %v1303_v22, %v1219_v58 }
 0x29d   :  { %1344 = vmatmul.f32.gmra.mxu2 %v1305_v8 }
 0x317   :  { %v1342_v26 = vpop.f32.mrf.mxu2 }
 0x318   :  { %v2553_v11 = vadd.f32 %v1660_v59, %v1342_v26 }
 0x31a   :  { %v2556_v20 = vmul.f32 0.70710677, %v2553_v11 }
 0x31c   :  { %v1352_v52 = vmul.f32 %v2556_v20, %v2556_v20 }
 0x31e   :  { %v1353_v29 = vmin.f32 %v1352_v52, 16.0 }
 0x320   :  { %v1354_v18 = vmul.f32 2.1237322e-06, %v1353_v29  ;;  %v1365_v31 = vmul.f32 3.8918573e-05, %v1353_v29  ;;  %v1345_v60 = vpop.f32.mrf.mxu2 }
 0x321   :  { %v2563_v38 = vadd.f32 %v1660_v59, %v1345_v60 }
 0x322   :  { %v1355_v43 = vadd.f32 0.00028619796, %v1354_v18  ;;  %v1366_v30 = vadd.f32 0.001143296, %v1365_v31 }
 0x323   :  { %v2569_v23 = vmul.f32 0.70710677, %v2563_v38  ;;  %v1349_v2 = vmul.f32 0.5, %v2563_v38 }
 0x324   :  { %v1356_v33 = vmul.f32 %v1355_v43, %v1353_v29  ;;  %v1367_v34 = vmul.f32 %v1366_v30, %v1353_v29 }
 0x325   :  { %v1392_v27 = vmul.f32 %v2569_v23, %v2569_v23 }
 0x326   :  { %v1357_v39 = vadd.f32 0.0036580483, %v1356_v33  ;;  %v1368_v9 = vadd.f32 0.014752088, %v1367_v34  ;;  %v1348_v33 = vmul.f32 0.5, %v2553_v11 }
 0x327   :  { %v1393_v49 = vmin.f32 %v1392_v27, 16.0 }
 0x328   :  { %v1369_v41 = vmul.f32 %v1368_v9, %v1353_v29  ;;  %v1358_v4 = vmul.f32 %v1357_v39, %v1353_v29 }
 0x329   :  { %v1394_v51 = vmul.f32 2.1237322e-06, %v1393_v49  ;;  %v1405_v47 = vmul.f32 3.8918573e-05, %v1393_v49 }
 0x32a   :  { %v1370_v44 = vadd.f32 0.112945676, %v1369_v41  ;;  %v1359_v37 = vadd.f32 0.05243302, %v1358_v4 }
 0x32b   :  { %v1395_v5 = vadd.f32 0.00028619796, %v1394_v51  ;;  %v1406_v53 = vadd.f32 0.001143296, %v1405_v47  ;;  %v1661_v47 = vld [vmem:[%s2651_s10] ss:$0 sm:$0xff] }
 0x32c   :  { %v1371_v42 = vmul.f32 %v1370_v44, %v1353_v29  ;;  %v1360_v1 = vmul.f32 %v1359_v37, %v1353_v29 }
 0x32d   :  { %v1396_v19 = vmul.f32 %v1395_v5, %v1393_v49  ;;  %v1407_v62 = vmul.f32 %v1406_v53, %v1393_v49 }
 0x32e   :  { %v1372_v50 = vadd.f32 0.4994258, %v1371_v42  ;;  %v1361_v10 = vadd.f32 0.18741608, %v1360_v1 }
 0x32f   :  { %v1408_v46 = vadd.f32 0.014752088, %v1407_v62  ;;  %v1397_v54 = vadd.f32 0.0036580483, %v1396_v19 }
 0x330   :  { %v1373_v15 = vmul.f32 %v1372_v50, %v1353_v29  ;;  %v1362_v13 = vmul.f32 %v1361_v10, %v1353_v29 }
 0x331   :  { %v1409_v35 = vmul.f32 %v1408_v46, %v1393_v49  ;;  %v1398_v7 = vmul.f32 %v1397_v54, %v1393_v49 }
 0x332   :  { %v1374_v63 = vadd.f32 1.0, %v1373_v15  ;;  %v1363_v24 = vadd.f32 1.1283791, %v1362_v13 }
 0x333   :  { %v1410_v6 = vadd.f32 0.112945676, %v1409_v35  ;;  %v1399_v25 = vadd.f32 0.05243302, %v1398_v7 }
 0x334   :  { %1691 = vrcp.f32 %v1374_v63  ;;  %v1386_v45 = vand.u32 2147483648, %v1374_v63  ;;  %v1384_v17 = vand.u32 2147483647, %v1374_v63  ;;  %vm1380_vm9 = vweird.f32 %v1374_v63 }
 0x335   :  { %v1411_v36 = vmul.f32 %v1410_v6, %v1393_v49  ;;  %v1400_v58 = vmul.f32 %v1399_v25, %v1393_v49  ;;  %v1364_v59 = vmul.f32 %v1363_v24, %v2556_v20  ;;  %v1567_v25 = vld [vmem:[%s2652_s11 + $0x10] sm:$0xff] }
 0x336   :  { %v1387_v8 = vor.u32 1.1754944e-38, %v1386_v45  ;;  %vm1385_vm11 = vcmp.eq.f32.partialorder %v1384_v17, 8.507059e+37 }
 0x337   :  { %v1412_v28 = vadd.f32 0.4994258, %v1411_v36  ;;  %v1401_v29 = vadd.f32 0.18741608, %v1400_v58 }
 0x339   :  { %v1413_v12 = vmul.f32 %v1412_v28, %v1393_v49  ;;  %v1402_v30 = vmul.f32 %v1401_v29, %v1393_v49 }
 0x33a   :  { %v1692_v16 = vpop.eup %1691 }
 0x33b   :  { %v1376_v14 = vmul.f32 %v1692_v16, %v1374_v63  ;;  %vm1381_vm8 = vweird.f32 %v1692_v16  ;;  %v1414_v48 = vadd.f32 1.0, %v1413_v12  ;;  %v1403_v9 = vadd.f32 1.1283791, %v1402_v30 }
 0x33c   :  { %vm1382_vm10 = vmor %vm1380_vm9, %vm1381_vm8 }
 0x33d   :  { %v1377_v61 = vsub.f32 1.0, %v1376_v14  ;;  %1693 = vrcp.f32 %v1414_v48  ;;  %v1426_v39 = vand.u32 2147483648, %v1414_v48  ;;  %v1424_v20 = vand.u32 2147483647, %v1414_v48 }
 0x33e   :  { %vm1420_vm14 = vweird.f32 %v1414_v48  ;;  %v1404_v3 = vmul.f32 %v1403_v9, %v2569_v23 }
 0x33f   :  { %v1378_v0 = vmul.f32 %v1692_v16, %v1377_v61  ;;  %v1427_v27 = vor.u32 1.1754944e-38, %v1426_v39  ;;  %vm1425_vm0 = vcmp.eq.f32.partialorder %v1424_v20, 8.507059e+37 }
 0x341   :  { %v1379_v22 = vadd.f32 %v1692_v16, %v1378_v0  ;;  %v1566_v0 = vld [vmem:[%s2652_s11 + $0x8] sm:$0xff] }
 0x343   :  { %v1383_v26 = vsel %vm1382_vm10, %v1692_v16, %v1379_v22  ;;  %v1694_v31 = vpop.eup %1693  ;;  %v1568_v16 = vld [vmem:[%s2652_s11 + $0x18] sm:$0xff]  ;;  %v1565_v22 = vld [vmem:[%s2652_s11] sm:$0xff] }
 0x344   :  { %v1388_v52 = vsel %vm1385_vm11, %v1387_v8, %v1383_v26  ;;  %v1416_v32 = vmul.f32 %v1694_v31, %v1414_v48  ;;  %vm1421_vm13 = vweird.f32 %v1694_v31  ;;  %1591 = vmatpush.msra.mxu3 %v1568_v16 }
 0x345   :  { %v1389_v18 = vmul.f32 %v1388_v52, %v1364_v59  ;;  %vm1422_vm15 = vmor %vm1420_vm14, %vm1421_vm13 }
 0x346   :  { %v1417_v60 = vsub.f32 1.0, %v1416_v32  ;;  %1592 = vmatpush.msra.mxu3 %v1567_v25 }
 0x347   :  { %v1639_v43 = vclamps-f32 %v1389_v18, 1.0 }
 0x348   :  { %v1418_v40 = vmul.f32 %v1694_v31, %v1417_v60  ;;  %1593 = vmatpush.msra.mxu3 %v1566_v0 }
 0x349   :  { %v1432_v34 = vadd.f32 1.0, %v1639_v43 }
 0x34a   :  { %v1419_v41 = vadd.f32 %v1694_v31, %v1418_v40  ;;  %1594 = vmatpush.msra.mxu3 %v1565_v22 }
 0x34b   :  { %v1434_v55 = vmul.f32 %v1432_v34, %v1348_v33 }
 0x34c   :  { %v1423_v4 = vsel %vm1422_vm15, %v1694_v31, %v1419_v41 }
 0x34d   :  { %1641 = vmatmul.msk.f32.vlgmr.msrb.gmra.mxu3 %vm1447_vm12, %v1434_v55  ;;  %v1428_v11 = vsel %vm1425_vm0, %v1427_v27, %v1423_v4 }
 0x34e   :  { %v1429_v44 = vmul.f32 %v1428_v11, %v1404_v3 }
 0x350   :  { %v1640_v49 = vclamps-f32 %v1429_v44, 1.0 }
 0x352   :  { %v1433_v42 = vadd.f32 1.0, %v1640_v49 }
 0x354   :  { %v1435_v51 = vmul.f32 %v1433_v42, %v1349_v2 }
 0x356   :  { %1642 = vmatmul.msk.f32.gmra.mxu3 %vm1447_vm12, %v1435_v51 }
 0x3d0   :  { %v1471_v56 = vpop.f32.mrf.mxu3 }
 0x3d1   :  { %v2600_v37 = vadd.f32 %v1661_v47, %v1471_v56 }
 0x3d3   :  { %v2603_v23 = vmul.f32 0.70710677, %v2600_v37 }
 0x3d5   :  { %v1481_v50 = vmul.f32 %v2603_v23, %v2603_v23 }
 0x3d7   :  { %v1482_v5 = vmin.f32 %v1481_v50, 16.0 }
 0x3d9   :  { %v1483_v53 = vmul.f32 2.1237322e-06, %v1482_v5  ;;  %v1494_v38 = vmul.f32 3.8918573e-05, %v1482_v5  ;;  %v1474_v21 = vpop.f32.mrf.mxu3 }
 0x3da   :  { %v2607_v1 = vadd.f32 %v1661_v47, %v1474_v21 }
 0x3db   :  { %v1484_v57 = vadd.f32 0.00028619796, %v1483_v53  ;;  %v1495_v15 = vadd.f32 0.001143296, %v1494_v38  ;;  %v1477_v38 = vmul.f32 0.5, %v2600_v37 }
 0x3dc   :  { %v2610_v54 = vmul.f32 0.70710677, %v2607_v1  ;;  %v1478_v16 = vmul.f32 0.5, %v2607_v1 }
 0x3dd   :  { %v1485_v19 = vmul.f32 %v1484_v57, %v1482_v5  ;;  %v1496_v62 = vmul.f32 %v1495_v15, %v1482_v5 }
 0x3de   :  { %v1521_v10 = vmul.f32 %v2610_v54, %v2610_v54 }
 0x3df   :  { %v1486_v63 = vadd.f32 0.0036580483, %v1485_v19  ;;  %v1497_v46 = vadd.f32 0.014752088, %v1496_v62 }
 0x3e0   :  { %v1522_v36 = vmin.f32 %v1521_v10, 16.0 }
 0x3e1   :  { %v1498_v35 = vmul.f32 %v1497_v46, %v1482_v5  ;;  %v1487_v6 = vmul.f32 %v1486_v63, %v1482_v5 }
 0x3e2   :  { %v1523_v14 = vmul.f32 2.1237322e-06, %v1522_v36  ;;  %v1534_v28 = vmul.f32 3.8918573e-05, %v1522_v36 }
 0x3e3   :  { %v1499_v7 = vadd.f32 0.112945676, %v1498_v35  ;;  %v1488_v61 = vadd.f32 0.05243302, %v1487_v6 }
 0x3e4   :  { %v1524_v24 = vadd.f32 0.00028619796, %v1523_v14  ;;  %v1535_v45 = vadd.f32 0.001143296, %v1534_v28  ;;  %v1662_v28 = vld [vmem:[%s2653_s12] ss:$0 sm:$0xff] }
 0x3e5   :  { %v1500_v13 = vmul.f32 %v1499_v7, %v1482_v5  ;;  %v1489_v8 = vmul.f32 %v1488_v61, %v1482_v5 }
 0x3e6   :  { %v1525_v48 = vmul.f32 %v1524_v24, %v1522_v36  ;;  %v1536_v58 = vmul.f32 %v1535_v45, %v1522_v36 }
 0x3e7   :  { %v1501_v12 = vadd.f32 0.4994258, %v1500_v13  ;;  %v1490_v18 = vadd.f32 0.18741608, %v1489_v8 }
 0x3e8   :  { %v1537_v26 = vadd.f32 0.014752088, %v1536_v58  ;;  %v1526_v52 = vadd.f32 0.0036580483, %v1525_v48 }
 0x3e9   :  { %v1502_v17 = vmul.f32 %v1501_v12, %v1482_v5  ;;  %v1491_v33 = vmul.f32 %v1490_v18, %v1482_v5 }
 0x3ea   :  { %v1538_v29 = vmul.f32 %v1537_v26, %v1522_v36  ;;  %v1527_v43 = vmul.f32 %v1526_v52, %v1522_v36 }
 0x3eb   :  { %v1503_v59 = vadd.f32 1.0, %v1502_v17  ;;  %v1492_v40 = vadd.f32 1.1283791, %v1491_v33 }
 0x3ec   :  { %v1539_v31 = vadd.f32 0.112945676, %v1538_v29  ;;  %v1528_v55 = vadd.f32 0.05243302, %v1527_v43 }
 0x3ed   :  { %1695 = vrcp.f32 %v1503_v59  ;;  %v1515_v20 = vand.u32 2147483648, %v1503_v59  ;;  %v1513_v27 = vand.u32 2147483647, %v1503_v59  ;;  %vm1509_vm2 = vweird.f32 %v1503_v59 }
 0x3ee   :  { %v1540_v30 = vmul.f32 %v1539_v31, %v1522_v36  ;;  %v1529_v4 = vmul.f32 %v1528_v55, %v1522_v36  ;;  %v1493_v49 = vmul.f32 %v1492_v40, %v2603_v23 }
 0x3ef   :  { %v1516_v44 = vor.u32 1.1754944e-38, %v1515_v20  ;;  %vm1514_vm4 = vcmp.eq.f32.partialorder %v1513_v27, 8.507059e+37 }
 0x3f0   :  { %v1541_v60 = vadd.f32 0.4994258, %v1540_v30  ;;  %v1530_v51 = vadd.f32 0.18741608, %v1529_v4 }
 0x3f2   :  { %v1542_v9 = vmul.f32 %v1541_v60, %v1522_v36  ;;  %v1531_v5 = vmul.f32 %v1530_v51, %v1522_v36 }
 0x3f3   :  { %v1696_v32 = vpop.eup %1695 }
 0x3f4   :  { %v1505_v34 = vmul.f32 %v1696_v32, %v1503_v59  ;;  %vm1510_vm1 = vweird.f32 %v1696_v32  ;;  %v1543_v3 = vadd.f32 1.0, %v1542_v9  ;;  %v1532_v21 = vadd.f32 1.1283791, %v1531_v5 }
 0x3f5   :  { %vm1511_vm3 = vmor %vm1509_vm2, %vm1510_vm1 }
 0x3f6   :  { %v1506_v39 = vsub.f32 1.0, %v1505_v34  ;;  %1697 = vrcp.f32 %v1543_v3  ;;  %v1555_v62 = vand.u32 2147483648, %v1543_v3  ;;  %v1553_v23 = vand.u32 2147483647, %v1543_v3 }
 0x3f7   :  { %vm1549_vm7 = vweird.f32 %v1543_v3  ;;  %v1533_v10 = vmul.f32 %v1532_v21, %v2610_v54 }
 0x3f8   :  { %v1507_v41 = vmul.f32 %v1696_v32, %v1506_v39  ;;  %v1556_v35 = vor.u32 1.1754944e-38, %v1555_v62  ;;  %vm1554_vm9 = vcmp.eq.f32.partialorder %v1553_v23, 8.507059e+37 }
 0x3fa   :  { %v1508_v11 = vadd.f32 %v1696_v32, %v1507_v41 }
 0x3fc   :  { %v1512_v2 = vsel %vm1511_vm3, %v1696_v32, %v1508_v11  ;;  %v1698_v56 = vpop.eup %1697 }
 0x3fd   :  { %v1517_v42 = vsel %vm1514_vm4, %v1516_v44, %v1512_v2  ;;  %v1545_v53 = vmul.f32 %v1698_v56, %v1543_v3  ;;  %vm1550_vm6 = vweird.f32 %v1698_v56 }
 0x3fe   :  { %v1518_v47 = vmul.f32 %v1517_v42, %v1493_v49  ;;  %vm1551_vm8 = vmor %vm1549_vm7, %vm1550_vm6 }
 0x3ff   :  { %v1546_v15 = vsub.f32 1.0, %v1545_v53 }
 0x400   :  { %v1643_v50 = vclamps-f32 %v1518_v47, 1.0 }
 0x401   :  { %v1547_v63 = vmul.f32 %v1698_v56, %v1546_v15 }
 0x402   :  { %v1561_v57 = vadd.f32 1.0, %v1643_v50 }
 0x403   :  { %v1548_v46 = vadd.f32 %v1698_v56, %v1547_v63 }
 0x404   :  { %v1563_v19 = vmul.f32 %v1561_v57, %v1477_v38 }
 0x405   :  { %v1552_v6 = vsel %vm1551_vm8, %v1698_v56, %v1548_v46 }
 0x406   :  { %1645 = vmatmul.msk.f32.vlgmr.msra.gmra.mxu3 %vm1572_vm5, %v1563_v19  ;;  %v1557_v37 = vsel %vm1554_vm9, %v1556_v35, %v1552_v6 }
 0x407   :  { %v1558_v7 = vmul.f32 %v1557_v37, %v1533_v10 }
 0x409   :  { %v1644_v36 = vclamps-f32 %v1558_v7, 1.0 }
 0x40b   :  { %v1562_v13 = vadd.f32 1.0, %v1644_v36 }
 0x40d   :  { %v1564_v14 = vmul.f32 %v1562_v13, %v1478_v16 }
 0x40f   :  { %1646 = vmatmul.msk.f32.gmra.mxu3 %vm1572_vm5, %v1564_v14 }
 0x489   :  { %v1596_v25 = vpop.f32.mrf.mxu3 }
 0x48a   :  { %v1597_v61 = vadd.f32 %v1662_v28, %v1596_v25 }
 0x48c   :  { %1602 = vst [vmem:[#allocation11] sm:$0xff] %v1597_v61 }
 0x492   :  { %v1599_v54 = vpop.f32.mrf.mxu3 }
 0x493   :  { %v1600_v12 = vadd.f32 %v1662_v28, %v1599_v54 }
 0x495   :  { %1603 = vst [vmem:[#allocation11 + $0x8] sm:$0xff] %v1600_v12 }
 0x496   :  { %1616 = dma.vmem_to_hbm [thread:$0]  %s1609_s8, 256, %s1611_s15, [#allocation4], %s1856_s26, %s1856_s26, %s1857_s28  }
 0x497   :  { %1849 = dma.done.wait [#allocation4], 256  }
 0x498   :  { %1850 = vsyncadd [#allocation4], 4294967040 }
 0x499   :  { %1621 = vsyncpa [#allocation3], 1 }
 0x49a   :  { %1622 = vsyncpa [#allocation6], 1 }
 0x49b   :  { %1623 = vsyncpa [#allocation9], 1 }
 0x49c   :  { %1624 = vsyncpa [#allocation4], 1 }

</bundles_post_ra>
